<compile_context>
chip_gen: v5e
topology: v5e:2x2
jax: 0.10.0
libtpu: 0.0.40
codegen_flags: <defaults>
</compile_context>

<pallas_src>
import functools

import jax
import jax.numpy as jnp
import numpy as np
from jax.experimental import pallas as pl
from jax.experimental.pallas import tpu as pltpu

KSIZE = 4                    # conv kernel size
STRIDES = (2, 2, 2, 1, 1)    # per-layer strides of the module
CO_PAD_LAST = 64             # pad the final Cout(=1) so the HBM output tile is 128 lanes wide


def _out_hw(n, s):
    # torch Conv2d with padding=1, kernel 4: floor((n + 2 - 4)/s) + 1
    return (n + 2 - KSIZE) // s + 1


# ----------------------------------------------------------------------------
# Kernel: whole forward pass for one image, straight-line matmuls on values
# ----------------------------------------------------------------------------
def _disc_kernel(*refs, n_layers):
    x_ref = refs[0]                                   # (H, W*Cin) f32
    rh_refs = refs[1:1 + n_layers]                    # (4, OH, Hin) bf16 0/1 row selectors
    bw_refs = refs[1 + n_layers:1 + 2 * n_layers]     # (4, Win*Ci, OW*Co) bf16 block-circulant weights
    sh_refs = refs[1 + 2 * n_layers:1 + 3 * n_layers]  # (1, OW*Co) f32 folded bias / BN shift
    out_ref = refs[1 + 3 * n_layers]                  # (OHf, OWf*CO_PAD_LAST) f32

    x = x_ref[...].astype(jnp.bfloat16)               # layer-0 activation, (Hin, Win*Ci)
    for l in range(n_layers):
        rh = rh_refs[l]
        bw = bw_refs[l]
        y = sh_refs[l][...]                           # (1, N) f32, broadcasts over output rows
        for kh in range(KSIZE):
            # circular-wrapped row gather (exact bf16 selection), then the fused
            # (kw-gather + conv weight + BN scale) matmul, accumulated in f32.
            xr = jnp.dot(rh[kh], x,
                         preferred_element_type=jnp.float32).astype(jnp.bfloat16)
            y = y + jnp.dot(xr, bw[kh], preferred_element_type=jnp.float32)
        if l < n_layers - 1:
            y = jnp.where(y >= 0.0, y, 0.2 * y)       # LeakyReLU(0.2); Dropout = identity (eval)
            x = y.astype(jnp.bfloat16)                # next layer's (Hin, Win*Ci)
        else:
            out_ref[...] = y                          # lane-dense (OHf, OWf*CO_PAD_LAST) store


# ----------------------------------------------------------------------------
# Host-side constant folding: circular pad + stride + im2col + BN scale -> matrices
# ----------------------------------------------------------------------------
def _prepare_constants(params, H, W):
    n_layers = len(params)
    rh_list, bw_list, sh_list, dims = [], [], [], []
    hin, win = H, W
    for l, p in enumerate(params):
        s = STRIDES[l]
        _, _, ci, co = p["w"].shape
        oh, ow = _out_hw(hin, s), _out_hw(win, s)
        co_eff = CO_PAD_LAST if l == n_layers - 1 else co

        # Row (kh) selector with circular wrap folded in: rh[kh] @ X gathers the
        # rows (s*oh + kh - 1) mod Hin of X for every output row oh.
        rh = np.zeros((KSIZE, oh, hin), np.float32)
        for kh in range(KSIZE):
            for o in range(oh):
                rh[kh, o, (s * o + kh - 1) % hin] = 1.0

        # Block-circulant weight: folds the kw gather (stride + circular wrap),
        # the conv weight and the BatchNorm scale.  The += handles tap aliasing
        # when the kernel is wider than the (circular) input (e.g. Win=3, k=4).
        w = (np.asarray(p["w"], np.float32)
             * np.asarray(p["scale"], np.float32)[None, None, None, :])
        bw = np.zeros((KSIZE, win * ci, ow * co_eff), np.float32)
        for kh in range(KSIZE):
            for kw in range(KSIZE):
                for o in range(ow):
                    wcol = (s * o + kw - 1) % win
                    bw[kh, wcol * ci:(wcol + 1) * ci,
                       o * co_eff:o * co_eff + co] += w[kh, kw]

        # Per-output-column shift row: bias (layers 0,4) or folded BN shift (1-3),
        # tiled over ow; padded output channels of the last layer get zero.
        sh = np.zeros((1, ow * co_eff), np.float32)
        shv = np.asarray(p["shift"], np.float32)
        for o in range(ow):
            sh[0, o * co_eff:o * co_eff + co] = shv

        rh_list.append(jnp.asarray(rh, jnp.bfloat16))
        bw_list.append(jnp.asarray(bw, jnp.bfloat16))
        sh_list.append(jnp.asarray(sh, jnp.float32))
        dims.append((oh, ow, co_eff))
        hin, win = oh, ow
    return rh_list, bw_list, sh_list, dims


# ----------------------------------------------------------------------------
# Parameter initialization (deterministic, synthetic; mirrors the torch module)
# ----------------------------------------------------------------------------
def init_params(key, in_ch=1, ndf=8):
    chans = [(in_ch, ndf), (ndf, 2 * ndf), (2 * ndf, 4 * ndf),
             (4 * ndf, 8 * ndf), (8 * ndf, 1)]
    params = []
    for li, (ci, co) in enumerate(chans):
        key, kw, kb, kg, kbt, km, kv = jax.random.split(key, 7)
        # torch Conv2d weight (Cout, Cin, KH, KW) -> stored as (KH, KW, Cin, Cout)
        w = 0.05 * jax.random.normal(kw, (co, ci, KSIZE, KSIZE), jnp.float32)
        w = jnp.transpose(w, (2, 3, 1, 0))
        p = {"w": w}
        if li in (0, 4):   # conv layers with bias, no BN
            p["scale"] = jnp.ones((co,), jnp.float32)
            p["shift"] = 0.05 * jax.random.normal(kb, (co,), jnp.float32)
        else:              # bias=False conv + BatchNorm2d (eval stats) folded
            gamma = 1.0 + 0.1 * jax.random.normal(kg, (co,), jnp.float32)
            beta = 0.1 * jax.random.normal(kbt, (co,), jnp.float32)
            mean = 0.1 * jax.random.normal(km, (co,), jnp.float32)
            var = 1.0 + 0.1 * jax.random.uniform(kv, (co,), jnp.float32)
            scale = gamma / jnp.sqrt(var + 1e-5)
            p["scale"] = scale
            p["shift"] = beta - mean * scale
        params.append(p)
    return params


# ----------------------------------------------------------------------------
# Build the fused forward (prepares folded constants once, returns jitted fn)
# ----------------------------------------------------------------------------
def build_forward(params, input_shape):
    B, cin, H, W = input_shape
    n_layers = len(params)
    assert n_layers == len(STRIDES)
    rh_list, bw_list, sh_list, dims = _prepare_constants(params, H, W)
    ohf, owf, cof = dims[-1]
    co_real = int(params[-1]["w"].shape[-1])
    consts = rh_list + bw_list + sh_list

    in_specs = [pl.BlockSpec((None, H, W * cin), lambda b: (b, 0, 0))]
    for c in consts:   # full-array blocks, constant index_map (fetched once)
        in_specs.append(pl.BlockSpec(c.shape, lambda b, _r=c.ndim: (0,) * _r))

    grid_spec = pltpu.PrefetchScalarGridSpec(
        num_scalar_prefetch=0,
        grid=(B,),
        in_specs=in_specs,
        out_specs=pl.BlockSpec((None, ohf, owf * cof), lambda b: (b, 0, 0)),
    )
    pallas_fn = pl.pallas_call(
        functools.partial(_disc_kernel, n_layers=n_layers),
        out_shape=jax.ShapeDtypeStruct((B, ohf, owf * cof), jnp.float32),
        grid_spec=grid_spec,
        compiler_params=pltpu.CompilerParams(
            dimension_semantics=("parallel",),
            vmem_limit_bytes=32 * 1024 * 1024,
        ),
    )

    def forward(x_nchw, noise=0.0):
        del noise  # TODO(synk): noise>0 (randn) / train-mode Dropout not implemented (eval path only)
        x = jnp.transpose(x_nchw, (0, 2, 3, 1)).astype(jnp.float32)  # NHWC
        x = x.reshape(B, H, W * cin)                                  # (H, W*C) channels-fastest
        out = pallas_fn(x, *consts)                                   # (B, OHf, OWf*CO_PAD_LAST)
        out = out.reshape(B, ohf, owf, cof)[..., :co_real]
        return jnp.transpose(out, (0, 3, 1, 2))                       # NCHW

    return jax.jit(forward)


# ----------------------------------------------------------------------------
# Pure-JAX reference (eval-mode module) for numerical cross-check
# ----------------------------------------------------------------------------
def _reference_forward(x_nchw, params):
    x = jnp.transpose(x_nchw, (0, 2, 3, 1)).astype(jnp.float32)
    for l, (p, s) in enumerate(zip(params, STRIDES)):
        xp = jnp.pad(x, ((0, 0), (1, 1), (1, 1), (0, 0)), mode="wrap")  # circular pad=1
        y = jax.lax.conv_general_dilated(
            xp, p["w"], window_strides=(s, s), padding="VALID",
            dimension_numbers=("NHWC", "HWIO", "NHWC"))
        y = y * p["scale"] + p["shift"]
        if l < len(params) - 1:
            y = jnp.where(y >= 0.0, y, 0.2 * y)
        x = y
    return jnp.transpose(x, (0, 3, 1, 2))


if __name__ == "__main__":
    key = jax.random.PRNGKey(0)
    kx, kp = jax.random.split(key)

    B, in_ch, H, W = 2, 1, 32, 32
    ndf = 8
    x = jax.random.normal(kx, (B, in_ch, H, W), jnp.float32)
    params = init_params(kp, in_ch=in_ch, ndf=ndf)

    fwd = build_forward(params, (B, in_ch, H, W))
    out = jax.block_until_ready(fwd(x))

    # spatial: 32 -> 16 -> 8 -> 4 -> 3 -> 2 ; final channels = 1
    assert out.shape == (B, 1, 2, 2), out.shape
    assert bool(jnp.all(jnp.isfinite(out)))

    ref = jax.block_until_ready(_reference_forward(x, params))
    np.testing.assert_allclose(np.asarray(out), np.asarray(ref),
                               rtol=0.1, atol=0.03)

    print("KERNEL_OK")
</pallas_src>

<mosaic_0001>
module attributes {stable_mosaic.version = 11 : i64} {
  func.func @_disc_kernel(%arg0: i32, %arg1: memref<1x32x32xf32, #tpu.memory_space<vmem>>, %arg2: memref<4x16x32xbf16, #tpu.memory_space<vmem>>, %arg3: memref<4x8x16xbf16, #tpu.memory_space<vmem>>, %arg4: memref<4x4x8xbf16, #tpu.memory_space<vmem>>, %arg5: memref<4x3x4xbf16, #tpu.memory_space<vmem>>, %arg6: memref<4x2x3xbf16, #tpu.memory_space<vmem>>, %arg7: memref<4x32x128xbf16, #tpu.memory_space<vmem>>, %arg8: memref<4x128x128xbf16, #tpu.memory_space<vmem>>, %arg9: memref<4x128x128xbf16, #tpu.memory_space<vmem>>, %arg10: memref<4x128x192xbf16, #tpu.memory_space<vmem>>, %arg11: memref<4x192x128xbf16, #tpu.memory_space<vmem>>, %arg12: memref<1x128xf32, #tpu.memory_space<vmem>>, %arg13: memref<1x128xf32, #tpu.memory_space<vmem>>, %arg14: memref<1x128xf32, #tpu.memory_space<vmem>>, %arg15: memref<1x192xf32, #tpu.memory_space<vmem>>, %arg16: memref<1x128xf32, #tpu.memory_space<vmem>>, %arg17: memref<1x2x128xf32, #tpu.memory_space<vmem>>) attributes {dimension_semantics = [#tpu.dimension_semantics<parallel>], iteration_bounds = array<i64: 2>, scalar_prefetch = 0 : i64, scratch_operands = 0 : i64, tpu.core_type = #tpu.core_type<tc>, window_params = [{transform_indices = @transform_0, window_bounds = array<i64: 1, 32, 32>}, {pipeline_mode = #tpu.pipeline_mode<synchronous>, transform_indices = @transform_1, window_bounds = array<i64: 4, 16, 32>}, {pipeline_mode = #tpu.pipeline_mode<synchronous>, transform_indices = @transform_2, window_bounds = array<i64: 4, 8, 16>}, {pipeline_mode = #tpu.pipeline_mode<synchronous>, transform_indices = @transform_3, window_bounds = array<i64: 4, 4, 8>}, {pipeline_mode = #tpu.pipeline_mode<synchronous>, transform_indices = @transform_4, window_bounds = array<i64: 4, 3, 4>}, {pipeline_mode = #tpu.pipeline_mode<synchronous>, transform_indices = @transform_5, window_bounds = array<i64: 4, 2, 3>}, {pipeline_mode = #tpu.pipeline_mode<synchronous>, transform_indices = @transform_6, window_bounds = array<i64: 4, 32, 128>}, {pipeline_mode = #tpu.pipeline_mode<synchronous>, transform_indices = @transform_7, window_bounds = array<i64: 4, 128, 128>}, {pipeline_mode = #tpu.pipeline_mode<synchronous>, transform_indices = @transform_8, window_bounds = array<i64: 4, 128, 128>}, {pipeline_mode = #tpu.pipeline_mode<synchronous>, transform_indices = @transform_9, window_bounds = array<i64: 4, 128, 192>}, {pipeline_mode = #tpu.pipeline_mode<synchronous>, transform_indices = @transform_10, window_bounds = array<i64: 4, 192, 128>}, {pipeline_mode = #tpu.pipeline_mode<synchronous>, transform_indices = @transform_11, window_bounds = array<i64: 1, 128>}, {pipeline_mode = #tpu.pipeline_mode<synchronous>, transform_indices = @transform_12, window_bounds = array<i64: 1, 128>}, {pipeline_mode = #tpu.pipeline_mode<synchronous>, transform_indices = @transform_13, window_bounds = array<i64: 1, 128>}, {pipeline_mode = #tpu.pipeline_mode<synchronous>, transform_indices = @transform_14, window_bounds = array<i64: 1, 192>}, {pipeline_mode = #tpu.pipeline_mode<synchronous>, transform_indices = @transform_15, window_bounds = array<i64: 1, 128>}, {transform_indices = @transform_16, window_bounds = array<i64: 1, 2, 128>}]} {
    %c0 = arith.constant 0 : index
    %c0_0 = arith.constant 0 : index
    %c0_1 = arith.constant 0 : index
    %0 = vector.load %arg1[%c0, %c0_0, %c0_1] : memref<1x32x32xf32, #tpu.memory_space<vmem>>, vector<1x32x32xf32>
    %1 = vector.shape_cast %0 : vector<1x32x32xf32> to vector<32x32xf32>
    %2 = arith.truncf %1 : vector<32x32xf32> to vector<32x32xbf16>
    %c0_2 = arith.constant 0 : index
    %c0_3 = arith.constant 0 : index
    %3 = vector.load %arg12[%c0_2, %c0_3] : memref<1x128xf32, #tpu.memory_space<vmem>>, vector<1x128xf32>
    %c0_4 = arith.constant 0 : index
    %c0_5 = arith.constant 0 : index
    %c0_6 = arith.constant 0 : index
    %4 = vector.load %arg2[%c0_4, %c0_5, %c0_6] : memref<4x16x32xbf16, #tpu.memory_space<vmem>>, vector<1x16x32xbf16>
    %5 = vector.shape_cast %4 : vector<1x16x32xbf16> to vector<16x32xbf16>
    %cst = arith.constant dense<0.000000e+00> : vector<16x32xf32>
    %6 = tpu.matmul %5, %2, %cst {dimension_numbers = #tpu.dot_dimension_numbers<[1], [0], [0], [1], [0, 0, 1, 1], [], []>} : vector<16x32xbf16>, vector<32x32xbf16>, vector<16x32xf32> -> vector<16x32xf32>
    %7 = arith.truncf %6 : vector<16x32xf32> to vector<16x32xbf16>
    %c0_7 = arith.constant 0 : index
    %c0_8 = arith.constant 0 : index
    %c0_9 = arith.constant 0 : index
    %8 = vector.load %arg7[%c0_7, %c0_8, %c0_9] : memref<4x32x128xbf16, #tpu.memory_space<vmem>>, vector<1x32x128xbf16>
    %9 = vector.shape_cast %8 : vector<1x32x128xbf16> to vector<32x128xbf16>
    %cst_10 = arith.constant dense<0.000000e+00> : vector<16x128xf32>
    %10 = tpu.matmul %7, %9, %cst_10 {dimension_numbers = #tpu.dot_dimension_numbers<[1], [0], [0], [1], [0, 0, 1, 1], [], []>} : vector<16x32xbf16>, vector<32x128xbf16>, vector<16x128xf32> -> vector<16x128xf32>
    %11 = vector.broadcast %3 : vector<1x128xf32> to vector<16x128xf32>
    %12 = arith.addf %11, %10 : vector<16x128xf32>
    %c1 = arith.constant 1 : index
    %c0_11 = arith.constant 0 : index
    %c0_12 = arith.constant 0 : index
    %13 = vector.load %arg2[%c1, %c0_11, %c0_12] : memref<4x16x32xbf16, #tpu.memory_space<vmem>>, vector<1x16x32xbf16>
    %14 = vector.shape_cast %13 : vector<1x16x32xbf16> to vector<16x32xbf16>
    %cst_13 = arith.constant dense<0.000000e+00> : vector<16x32xf32>
    %15 = tpu.matmul %14, %2, %cst_13 {dimension_numbers = #tpu.dot_dimension_numbers<[1], [0], [0], [1], [0, 0, 1, 1], [], []>} : vector<16x32xbf16>, vector<32x32xbf16>, vector<16x32xf32> -> vector<16x32xf32>
    %16 = arith.truncf %15 : vector<16x32xf32> to vector<16x32xbf16>
    %c1_14 = arith.constant 1 : index
    %c0_15 = arith.constant 0 : index
    %c0_16 = arith.constant 0 : index
    %17 = vector.load %arg7[%c1_14, %c0_15, %c0_16] : memref<4x32x128xbf16, #tpu.memory_space<vmem>>, vector<1x32x128xbf16>
    %18 = vector.shape_cast %17 : vector<1x32x128xbf16> to vector<32x128xbf16>
    %cst_17 = arith.constant dense<0.000000e+00> : vector<16x128xf32>
    %19 = tpu.matmul %16, %18, %cst_17 {dimension_numbers = #tpu.dot_dimension_numbers<[1], [0], [0], [1], [0, 0, 1, 1], [], []>} : vector<16x32xbf16>, vector<32x128xbf16>, vector<16x128xf32> -> vector<16x128xf32>
    %20 = arith.addf %12, %19 : vector<16x128xf32>
    %c2 = arith.constant 2 : index
    %c0_18 = arith.constant 0 : index
    %c0_19 = arith.constant 0 : index
    %21 = vector.load %arg2[%c2, %c0_18, %c0_19] : memref<4x16x32xbf16, #tpu.memory_space<vmem>>, vector<1x16x32xbf16>
    %22 = vector.shape_cast %21 : vector<1x16x32xbf16> to vector<16x32xbf16>
    %cst_20 = arith.constant dense<0.000000e+00> : vector<16x32xf32>
    %23 = tpu.matmul %22, %2, %cst_20 {dimension_numbers = #tpu.dot_dimension_numbers<[1], [0], [0], [1], [0, 0, 1, 1], [], []>} : vector<16x32xbf16>, vector<32x32xbf16>, vector<16x32xf32> -> vector<16x32xf32>
    %24 = arith.truncf %23 : vector<16x32xf32> to vector<16x32xbf16>
    %c2_21 = arith.constant 2 : index
    %c0_22 = arith.constant 0 : index
    %c0_23 = arith.constant 0 : index
    %25 = vector.load %arg7[%c2_21, %c0_22, %c0_23] : memref<4x32x128xbf16, #tpu.memory_space<vmem>>, vector<1x32x128xbf16>
    %26 = vector.shape_cast %25 : vector<1x32x128xbf16> to vector<32x128xbf16>
    %cst_24 = arith.constant dense<0.000000e+00> : vector<16x128xf32>
    %27 = tpu.matmul %24, %26, %cst_24 {dimension_numbers = #tpu.dot_dimension_numbers<[1], [0], [0], [1], [0, 0, 1, 1], [], []>} : vector<16x32xbf16>, vector<32x128xbf16>, vector<16x128xf32> -> vector<16x128xf32>
    %28 = arith.addf %20, %27 : vector<16x128xf32>
    %c3 = arith.constant 3 : index
    %c0_25 = arith.constant 0 : index
    %c0_26 = arith.constant 0 : index
    %29 = vector.load %arg2[%c3, %c0_25, %c0_26] : memref<4x16x32xbf16, #tpu.memory_space<vmem>>, vector<1x16x32xbf16>
    %30 = vector.shape_cast %29 : vector<1x16x32xbf16> to vector<16x32xbf16>
    %cst_27 = arith.constant dense<0.000000e+00> : vector<16x32xf32>
    %31 = tpu.matmul %30, %2, %cst_27 {dimension_numbers = #tpu.dot_dimension_numbers<[1], [0], [0], [1], [0, 0, 1, 1], [], []>} : vector<16x32xbf16>, vector<32x32xbf16>, vector<16x32xf32> -> vector<16x32xf32>
    %32 = arith.truncf %31 : vector<16x32xf32> to vector<16x32xbf16>
    %c3_28 = arith.constant 3 : index
    %c0_29 = arith.constant 0 : index
    %c0_30 = arith.constant 0 : index
    %33 = vector.load %arg7[%c3_28, %c0_29, %c0_30] : memref<4x32x128xbf16, #tpu.memory_space<vmem>>, vector<1x32x128xbf16>
    %34 = vector.shape_cast %33 : vector<1x32x128xbf16> to vector<32x128xbf16>
    %cst_31 = arith.constant dense<0.000000e+00> : vector<16x128xf32>
    %35 = tpu.matmul %32, %34, %cst_31 {dimension_numbers = #tpu.dot_dimension_numbers<[1], [0], [0], [1], [0, 0, 1, 1], [], []>} : vector<16x32xbf16>, vector<32x128xbf16>, vector<16x128xf32> -> vector<16x128xf32>
    %36 = arith.addf %28, %35 : vector<16x128xf32>
    %cst_32 = arith.constant 0.000000e+00 : f32
    %37 = vector.broadcast %cst_32 : f32 to vector<16x128xf32>
    %38 = arith.cmpf oge, %36, %37 : vector<16x128xf32>
    %cst_33 = arith.constant 2.000000e-01 : f32
    %39 = vector.broadcast %cst_33 : f32 to vector<16x128xf32>
    %40 = arith.mulf %39, %36 : vector<16x128xf32>
    %41 = arith.select %38, %36, %40 : vector<16x128xi1>, vector<16x128xf32>
    %42 = arith.truncf %41 : vector<16x128xf32> to vector<16x128xbf16>
    %c0_34 = arith.constant 0 : index
    %c0_35 = arith.constant 0 : index
    %43 = vector.load %arg13[%c0_34, %c0_35] : memref<1x128xf32, #tpu.memory_space<vmem>>, vector<1x128xf32>
    %c0_36 = arith.constant 0 : index
    %c0_37 = arith.constant 0 : index
    %c0_38 = arith.constant 0 : index
    %44 = vector.load %arg3[%c0_36, %c0_37, %c0_38] : memref<4x8x16xbf16, #tpu.memory_space<vmem>>, vector<1x8x16xbf16>
    %45 = vector.shape_cast %44 : vector<1x8x16xbf16> to vector<8x16xbf16>
    %cst_39 = arith.constant dense<0.000000e+00> : vector<8x128xf32>
    %46 = tpu.matmul %45, %42, %cst_39 {dimension_numbers = #tpu.dot_dimension_numbers<[1], [0], [0], [1], [0, 0, 1, 1], [], []>} : vector<8x16xbf16>, vector<16x128xbf16>, vector<8x128xf32> -> vector<8x128xf32>
    %47 = arith.truncf %46 : vector<8x128xf32> to vector<8x128xbf16>
    %c0_40 = arith.constant 0 : index
    %c0_41 = arith.constant 0 : index
    %c0_42 = arith.constant 0 : index
    %48 = vector.load %arg8[%c0_40, %c0_41, %c0_42] : memref<4x128x128xbf16, #tpu.memory_space<vmem>>, vector<1x128x128xbf16>
    %49 = vector.shape_cast %48 : vector<1x128x128xbf16> to vector<128x128xbf16>
    %cst_43 = arith.constant dense<0.000000e+00> : vector<8x128xf32>
    %50 = tpu.matmul %47, %49, %cst_43 {dimension_numbers = #tpu.dot_dimension_numbers<[1], [0], [0], [1], [0, 0, 1, 1], [], []>} : vector<8x128xbf16>, vector<128x128xbf16>, vector<8x128xf32> -> vector<8x128xf32>
    %51 = vector.broadcast %43 : vector<1x128xf32> to vector<8x128xf32>
    %52 = arith.addf %51, %50 : vector<8x128xf32>
    %c1_44 = arith.constant 1 : index
    %c0_45 = arith.constant 0 : index
    %c0_46 = arith.constant 0 : index
    %53 = vector.load %arg3[%c1_44, %c0_45, %c0_46] : memref<4x8x16xbf16, #tpu.memory_space<vmem>>, vector<1x8x16xbf16>
    %54 = vector.shape_cast %53 : vector<1x8x16xbf16> to vector<8x16xbf16>
    %cst_47 = arith.constant dense<0.000000e+00> : vector<8x128xf32>
    %55 = tpu.matmul %54, %42, %cst_47 {dimension_numbers = #tpu.dot_dimension_numbers<[1], [0], [0], [1], [0, 0, 1, 1], [], []>} : vector<8x16xbf16>, vector<16x128xbf16>, vector<8x128xf32> -> vector<8x128xf32>
    %56 = arith.truncf %55 : vector<8x128xf32> to vector<8x128xbf16>
    %c1_48 = arith.constant 1 : index
    %c0_49 = arith.constant 0 : index
    %c0_50 = arith.constant 0 : index
    %57 = vector.load %arg8[%c1_48, %c0_49, %c0_50] : memref<4x128x128xbf16, #tpu.memory_space<vmem>>, vector<1x128x128xbf16>
    %58 = vector.shape_cast %57 : vector<1x128x128xbf16> to vector<128x128xbf16>
    %cst_51 = arith.constant dense<0.000000e+00> : vector<8x128xf32>
    %59 = tpu.matmul %56, %58, %cst_51 {dimension_numbers = #tpu.dot_dimension_numbers<[1], [0], [0], [1], [0, 0, 1, 1], [], []>} : vector<8x128xbf16>, vector<128x128xbf16>, vector<8x128xf32> -> vector<8x128xf32>
    %60 = arith.addf %52, %59 : vector<8x128xf32>
    %c2_52 = arith.constant 2 : index
    %c0_53 = arith.constant 0 : index
    %c0_54 = arith.constant 0 : index
    %61 = vector.load %arg3[%c2_52, %c0_53, %c0_54] : memref<4x8x16xbf16, #tpu.memory_space<vmem>>, vector<1x8x16xbf16>
    %62 = vector.shape_cast %61 : vector<1x8x16xbf16> to vector<8x16xbf16>
    %cst_55 = arith.constant dense<0.000000e+00> : vector<8x128xf32>
    %63 = tpu.matmul %62, %42, %cst_55 {dimension_numbers = #tpu.dot_dimension_numbers<[1], [0], [0], [1], [0, 0, 1, 1], [], []>} : vector<8x16xbf16>, vector<16x128xbf16>, vector<8x128xf32> -> vector<8x128xf32>
    %64 = arith.truncf %63 : vector<8x128xf32> to vector<8x128xbf16>
    %c2_56 = arith.constant 2 : index
    %c0_57 = arith.constant 0 : index
    %c0_58 = arith.constant 0 : index
    %65 = vector.load %arg8[%c2_56, %c0_57, %c0_58] : memref<4x128x128xbf16, #tpu.memory_space<vmem>>, vector<1x128x128xbf16>
    %66 = vector.shape_cast %65 : vector<1x128x128xbf16> to vector<128x128xbf16>
    %cst_59 = arith.constant dense<0.000000e+00> : vector<8x128xf32>
    %67 = tpu.matmul %64, %66, %cst_59 {dimension_numbers = #tpu.dot_dimension_numbers<[1], [0], [0], [1], [0, 0, 1, 1], [], []>} : vector<8x128xbf16>, vector<128x128xbf16>, vector<8x128xf32> -> vector<8x128xf32>
    %68 = arith.addf %60, %67 : vector<8x128xf32>
    %c3_60 = arith.constant 3 : index
    %c0_61 = arith.constant 0 : index
    %c0_62 = arith.constant 0 : index
    %69 = vector.load %arg3[%c3_60, %c0_61, %c0_62] : memref<4x8x16xbf16, #tpu.memory_space<vmem>>, vector<1x8x16xbf16>
    %70 = vector.shape_cast %69 : vector<1x8x16xbf16> to vector<8x16xbf16>
    %cst_63 = arith.constant dense<0.000000e+00> : vector<8x128xf32>
    %71 = tpu.matmul %70, %42, %cst_63 {dimension_numbers = #tpu.dot_dimension_numbers<[1], [0], [0], [1], [0, 0, 1, 1], [], []>} : vector<8x16xbf16>, vector<16x128xbf16>, vector<8x128xf32> -> vector<8x128xf32>
    %72 = arith.truncf %71 : vector<8x128xf32> to vector<8x128xbf16>
    %c3_64 = arith.constant 3 : index
    %c0_65 = arith.constant 0 : index
    %c0_66 = arith.constant 0 : index
    %73 = vector.load %arg8[%c3_64, %c0_65, %c0_66] : memref<4x128x128xbf16, #tpu.memory_space<vmem>>, vector<1x128x128xbf16>
    %74 = vector.shape_cast %73 : vector<1x128x128xbf16> to vector<128x128xbf16>
    %cst_67 = arith.constant dense<0.000000e+00> : vector<8x128xf32>
    %75 = tpu.matmul %72, %74, %cst_67 {dimension_numbers = #tpu.dot_dimension_numbers<[1], [0], [0], [1], [0, 0, 1, 1], [], []>} : vector<8x128xbf16>, vector<128x128xbf16>, vector<8x128xf32> -> vector<8x128xf32>
    %76 = arith.addf %68, %75 : vector<8x128xf32>
    %cst_68 = arith.constant 0.000000e+00 : f32
    %77 = vector.broadcast %cst_68 : f32 to vector<8x128xf32>
    %78 = arith.cmpf oge, %76, %77 : vector<8x128xf32>
    %cst_69 = arith.constant 2.000000e-01 : f32
    %79 = vector.broadcast %cst_69 : f32 to vector<8x128xf32>
    %80 = arith.mulf %79, %76 : vector<8x128xf32>
    %81 = arith.select %78, %76, %80 : vector<8x128xi1>, vector<8x128xf32>
    %82 = arith.truncf %81 : vector<8x128xf32> to vector<8x128xbf16>
    %c0_70 = arith.constant 0 : index
    %c0_71 = arith.constant 0 : index
    %83 = vector.load %arg14[%c0_70, %c0_71] : memref<1x128xf32, #tpu.memory_space<vmem>>, vector<1x128xf32>
    %c0_72 = arith.constant 0 : index
    %c0_73 = arith.constant 0 : index
    %c0_74 = arith.constant 0 : index
    %84 = vector.load %arg4[%c0_72, %c0_73, %c0_74] : memref<4x4x8xbf16, #tpu.memory_space<vmem>>, vector<1x4x8xbf16>
    %85 = vector.shape_cast %84 : vector<1x4x8xbf16> to vector<4x8xbf16>
    %cst_75 = arith.constant dense<0.000000e+00> : vector<4x128xf32>
    %86 = tpu.matmul %85, %82, %cst_75 {dimension_numbers = #tpu.dot_dimension_numbers<[1], [0], [0], [1], [0, 0, 1, 1], [], []>} : vector<4x8xbf16>, vector<8x128xbf16>, vector<4x128xf32> -> vector<4x128xf32>
    %87 = arith.truncf %86 : vector<4x128xf32> to vector<4x128xbf16>
    %c0_76 = arith.constant 0 : index
    %c0_77 = arith.constant 0 : index
    %c0_78 = arith.constant 0 : index
    %88 = vector.load %arg9[%c0_76, %c0_77, %c0_78] : memref<4x128x128xbf16, #tpu.memory_space<vmem>>, vector<1x128x128xbf16>
    %89 = vector.shape_cast %88 : vector<1x128x128xbf16> to vector<128x128xbf16>
    %cst_79 = arith.constant dense<0.000000e+00> : vector<4x128xf32>
    %90 = tpu.matmul %87, %89, %cst_79 {dimension_numbers = #tpu.dot_dimension_numbers<[1], [0], [0], [1], [0, 0, 1, 1], [], []>} : vector<4x128xbf16>, vector<128x128xbf16>, vector<4x128xf32> -> vector<4x128xf32>
    %91 = vector.broadcast %83 : vector<1x128xf32> to vector<4x128xf32>
    %92 = arith.addf %91, %90 : vector<4x128xf32>
    %c1_80 = arith.constant 1 : index
    %c0_81 = arith.constant 0 : index
    %c0_82 = arith.constant 0 : index
    %93 = vector.load %arg4[%c1_80, %c0_81, %c0_82] : memref<4x4x8xbf16, #tpu.memory_space<vmem>>, vector<1x4x8xbf16>
    %94 = vector.shape_cast %93 : vector<1x4x8xbf16> to vector<4x8xbf16>
    %cst_83 = arith.constant dense<0.000000e+00> : vector<4x128xf32>
    %95 = tpu.matmul %94, %82, %cst_83 {dimension_numbers = #tpu.dot_dimension_numbers<[1], [0], [0], [1], [0, 0, 1, 1], [], []>} : vector<4x8xbf16>, vector<8x128xbf16>, vector<4x128xf32> -> vector<4x128xf32>
    %96 = arith.truncf %95 : vector<4x128xf32> to vector<4x128xbf16>
    %c1_84 = arith.constant 1 : index
    %c0_85 = arith.constant 0 : index
    %c0_86 = arith.constant 0 : index
    %97 = vector.load %arg9[%c1_84, %c0_85, %c0_86] : memref<4x128x128xbf16, #tpu.memory_space<vmem>>, vector<1x128x128xbf16>
    %98 = vector.shape_cast %97 : vector<1x128x128xbf16> to vector<128x128xbf16>
    %cst_87 = arith.constant dense<0.000000e+00> : vector<4x128xf32>
    %99 = tpu.matmul %96, %98, %cst_87 {dimension_numbers = #tpu.dot_dimension_numbers<[1], [0], [0], [1], [0, 0, 1, 1], [], []>} : vector<4x128xbf16>, vector<128x128xbf16>, vector<4x128xf32> -> vector<4x128xf32>
    %100 = arith.addf %92, %99 : vector<4x128xf32>
    %c2_88 = arith.constant 2 : index
    %c0_89 = arith.constant 0 : index
    %c0_90 = arith.constant 0 : index
    %101 = vector.load %arg4[%c2_88, %c0_89, %c0_90] : memref<4x4x8xbf16, #tpu.memory_space<vmem>>, vector<1x4x8xbf16>
    %102 = vector.shape_cast %101 : vector<1x4x8xbf16> to vector<4x8xbf16>
    %cst_91 = arith.constant dense<0.000000e+00> : vector<4x128xf32>
    %103 = tpu.matmul %102, %82, %cst_91 {dimension_numbers = #tpu.dot_dimension_numbers<[1], [0], [0], [1], [0, 0, 1, 1], [], []>} : vector<4x8xbf16>, vector<8x128xbf16>, vector<4x128xf32> -> vector<4x128xf32>
    %104 = arith.truncf %103 : vector<4x128xf32> to vector<4x128xbf16>
    %c2_92 = arith.constant 2 : index
    %c0_93 = arith.constant 0 : index
    %c0_94 = arith.constant 0 : index
    %105 = vector.load %arg9[%c2_92, %c0_93, %c0_94] : memref<4x128x128xbf16, #tpu.memory_space<vmem>>, vector<1x128x128xbf16>
    %106 = vector.shape_cast %105 : vector<1x128x128xbf16> to vector<128x128xbf16>
    %cst_95 = arith.constant dense<0.000000e+00> : vector<4x128xf32>
    %107 = tpu.matmul %104, %106, %cst_95 {dimension_numbers = #tpu.dot_dimension_numbers<[1], [0], [0], [1], [0, 0, 1, 1], [], []>} : vector<4x128xbf16>, vector<128x128xbf16>, vector<4x128xf32> -> vector<4x128xf32>
    %108 = arith.addf %100, %107 : vector<4x128xf32>
    %c3_96 = arith.constant 3 : index
    %c0_97 = arith.constant 0 : index
    %c0_98 = arith.constant 0 : index
    %109 = vector.load %arg4[%c3_96, %c0_97, %c0_98] : memref<4x4x8xbf16, #tpu.memory_space<vmem>>, vector<1x4x8xbf16>
    %110 = vector.shape_cast %109 : vector<1x4x8xbf16> to vector<4x8xbf16>
    %cst_99 = arith.constant dense<0.000000e+00> : vector<4x128xf32>
    %111 = tpu.matmul %110, %82, %cst_99 {dimension_numbers = #tpu.dot_dimension_numbers<[1], [0], [0], [1], [0, 0, 1, 1], [], []>} : vector<4x8xbf16>, vector<8x128xbf16>, vector<4x128xf32> -> vector<4x128xf32>
    %112 = arith.truncf %111 : vector<4x128xf32> to vector<4x128xbf16>
    %c3_100 = arith.constant 3 : index
    %c0_101 = arith.constant 0 : index
    %c0_102 = arith.constant 0 : index
    %113 = vector.load %arg9[%c3_100, %c0_101, %c0_102] : memref<4x128x128xbf16, #tpu.memory_space<vmem>>, vector<1x128x128xbf16>
    %114 = vector.shape_cast %113 : vector<1x128x128xbf16> to vector<128x128xbf16>
    %cst_103 = arith.constant dense<0.000000e+00> : vector<4x128xf32>
    %115 = tpu.matmul %112, %114, %cst_103 {dimension_numbers = #tpu.dot_dimension_numbers<[1], [0], [0], [1], [0, 0, 1, 1], [], []>} : vector<4x128xbf16>, vector<128x128xbf16>, vector<4x128xf32> -> vector<4x128xf32>
    %116 = arith.addf %108, %115 : vector<4x128xf32>
    %cst_104 = arith.constant 0.000000e+00 : f32
    %117 = vector.broadcast %cst_104 : f32 to vector<4x128xf32>
    %118 = arith.cmpf oge, %116, %117 : vector<4x128xf32>
    %cst_105 = arith.constant 2.000000e-01 : f32
    %119 = vector.broadcast %cst_105 : f32 to vector<4x128xf32>
    %120 = arith.mulf %119, %116 : vector<4x128xf32>
    %121 = arith.select %118, %116, %120 : vector<4x128xi1>, vector<4x128xf32>
    %122 = arith.truncf %121 : vector<4x128xf32> to vector<4x128xbf16>
    %c0_106 = arith.constant 0 : index
    %c0_107 = arith.constant 0 : index
    %123 = vector.load %arg15[%c0_106, %c0_107] : memref<1x192xf32, #tpu.memory_space<vmem>>, vector<1x192xf32>
    %c0_108 = arith.constant 0 : index
    %c0_109 = arith.constant 0 : index
    %c0_110 = arith.constant 0 : index
    %124 = vector.load %arg5[%c0_108, %c0_109, %c0_110] : memref<4x3x4xbf16, #tpu.memory_space<vmem>>, vector<1x3x4xbf16>
    %125 = vector.shape_cast %124 : vector<1x3x4xbf16> to vector<3x4xbf16>
    %cst_111 = arith.constant dense<0.000000e+00> : vector<3x128xf32>
    %126 = tpu.matmul %125, %122, %cst_111 {dimension_numbers = #tpu.dot_dimension_numbers<[1], [0], [0], [1], [0, 0, 1, 1], [], []>} : vector<3x4xbf16>, vector<4x128xbf16>, vector<3x128xf32> -> vector<3x128xf32>
    %127 = arith.truncf %126 : vector<3x128xf32> to vector<3x128xbf16>
    %c0_112 = arith.constant 0 : index
    %c0_113 = arith.constant 0 : index
    %c0_114 = arith.constant 0 : index
    %128 = vector.load %arg10[%c0_112, %c0_113, %c0_114] : memref<4x128x192xbf16, #tpu.memory_space<vmem>>, vector<1x128x192xbf16>
    %129 = vector.shape_cast %128 : vector<1x128x192xbf16> to vector<128x192xbf16>
    %cst_115 = arith.constant dense<0.000000e+00> : vector<3x192xf32>
    %130 = tpu.matmul %127, %129, %cst_115 {dimension_numbers = #tpu.dot_dimension_numbers<[1], [0], [0], [1], [0, 0, 1, 1], [], []>} : vector<3x128xbf16>, vector<128x192xbf16>, vector<3x192xf32> -> vector<3x192xf32>
    %131 = vector.broadcast %123 : vector<1x192xf32> to vector<3x192xf32>
    %132 = arith.addf %131, %130 : vector<3x192xf32>
    %c1_116 = arith.constant 1 : index
    %c0_117 = arith.constant 0 : index
    %c0_118 = arith.constant 0 : index
    %133 = vector.load %arg5[%c1_116, %c0_117, %c0_118] : memref<4x3x4xbf16, #tpu.memory_space<vmem>>, vector<1x3x4xbf16>
    %134 = vector.shape_cast %133 : vector<1x3x4xbf16> to vector<3x4xbf16>
    %cst_119 = arith.constant dense<0.000000e+00> : vector<3x128xf32>
    %135 = tpu.matmul %134, %122, %cst_119 {dimension_numbers = #tpu.dot_dimension_numbers<[1], [0], [0], [1], [0, 0, 1, 1], [], []>} : vector<3x4xbf16>, vector<4x128xbf16>, vector<3x128xf32> -> vector<3x128xf32>
    %136 = arith.truncf %135 : vector<3x128xf32> to vector<3x128xbf16>
    %c1_120 = arith.constant 1 : index
    %c0_121 = arith.constant 0 : index
    %c0_122 = arith.constant 0 : index
    %137 = vector.load %arg10[%c1_120, %c0_121, %c0_122] : memref<4x128x192xbf16, #tpu.memory_space<vmem>>, vector<1x128x192xbf16>
    %138 = vector.shape_cast %137 : vector<1x128x192xbf16> to vector<128x192xbf16>
    %cst_123 = arith.constant dense<0.000000e+00> : vector<3x192xf32>
    %139 = tpu.matmul %136, %138, %cst_123 {dimension_numbers = #tpu.dot_dimension_numbers<[1], [0], [0], [1], [0, 0, 1, 1], [], []>} : vector<3x128xbf16>, vector<128x192xbf16>, vector<3x192xf32> -> vector<3x192xf32>
    %140 = arith.addf %132, %139 : vector<3x192xf32>
    %c2_124 = arith.constant 2 : index
    %c0_125 = arith.constant 0 : index
    %c0_126 = arith.constant 0 : index
    %141 = vector.load %arg5[%c2_124, %c0_125, %c0_126] : memref<4x3x4xbf16, #tpu.memory_space<vmem>>, vector<1x3x4xbf16>
    %142 = vector.shape_cast %141 : vector<1x3x4xbf16> to vector<3x4xbf16>
    %cst_127 = arith.constant dense<0.000000e+00> : vector<3x128xf32>
    %143 = tpu.matmul %142, %122, %cst_127 {dimension_numbers = #tpu.dot_dimension_numbers<[1], [0], [0], [1], [0, 0, 1, 1], [], []>} : vector<3x4xbf16>, vector<4x128xbf16>, vector<3x128xf32> -> vector<3x128xf32>
    %144 = arith.truncf %143 : vector<3x128xf32> to vector<3x128xbf16>
    %c2_128 = arith.constant 2 : index
    %c0_129 = arith.constant 0 : index
    %c0_130 = arith.constant 0 : index
    %145 = vector.load %arg10[%c2_128, %c0_129, %c0_130] : memref<4x128x192xbf16, #tpu.memory_space<vmem>>, vector<1x128x192xbf16>
    %146 = vector.shape_cast %145 : vector<1x128x192xbf16> to vector<128x192xbf16>
    %cst_131 = arith.constant dense<0.000000e+00> : vector<3x192xf32>
    %147 = tpu.matmul %144, %146, %cst_131 {dimension_numbers = #tpu.dot_dimension_numbers<[1], [0], [0], [1], [0, 0, 1, 1], [], []>} : vector<3x128xbf16>, vector<128x192xbf16>, vector<3x192xf32> -> vector<3x192xf32>
    %148 = arith.addf %140, %147 : vector<3x192xf32>
    %c3_132 = arith.constant 3 : index
    %c0_133 = arith.constant 0 : index
    %c0_134 = arith.constant 0 : index
    %149 = vector.load %arg5[%c3_132, %c0_133, %c0_134] : memref<4x3x4xbf16, #tpu.memory_space<vmem>>, vector<1x3x4xbf16>
    %150 = vector.shape_cast %149 : vector<1x3x4xbf16> to vector<3x4xbf16>
    %cst_135 = arith.constant dense<0.000000e+00> : vector<3x128xf32>
    %151 = tpu.matmul %150, %122, %cst_135 {dimension_numbers = #tpu.dot_dimension_numbers<[1], [0], [0], [1], [0, 0, 1, 1], [], []>} : vector<3x4xbf16>, vector<4x128xbf16>, vector<3x128xf32> -> vector<3x128xf32>
    %152 = arith.truncf %151 : vector<3x128xf32> to vector<3x128xbf16>
    %c3_136 = arith.constant 3 : index
    %c0_137 = arith.constant 0 : index
    %c0_138 = arith.constant 0 : index
    %153 = vector.load %arg10[%c3_136, %c0_137, %c0_138] : memref<4x128x192xbf16, #tpu.memory_space<vmem>>, vector<1x128x192xbf16>
    %154 = vector.shape_cast %153 : vector<1x128x192xbf16> to vector<128x192xbf16>
    %cst_139 = arith.constant dense<0.000000e+00> : vector<3x192xf32>
    %155 = tpu.matmul %152, %154, %cst_139 {dimension_numbers = #tpu.dot_dimension_numbers<[1], [0], [0], [1], [0, 0, 1, 1], [], []>} : vector<3x128xbf16>, vector<128x192xbf16>, vector<3x192xf32> -> vector<3x192xf32>
    %156 = arith.addf %148, %155 : vector<3x192xf32>
    %cst_140 = arith.constant 0.000000e+00 : f32
    %157 = vector.broadcast %cst_140 : f32 to vector<3x192xf32>
    %158 = arith.cmpf oge, %156, %157 : vector<3x192xf32>
    %cst_141 = arith.constant 2.000000e-01 : f32
    %159 = vector.broadcast %cst_141 : f32 to vector<3x192xf32>
    %160 = arith.mulf %159, %156 : vector<3x192xf32>
    %161 = arith.select %158, %156, %160 : vector<3x192xi1>, vector<3x192xf32>
    %162 = arith.truncf %161 : vector<3x192xf32> to vector<3x192xbf16>
    %c0_142 = arith.constant 0 : index
    %c0_143 = arith.constant 0 : index
    %163 = vector.load %arg16[%c0_142, %c0_143] : memref<1x128xf32, #tpu.memory_space<vmem>>, vector<1x128xf32>
    %c0_144 = arith.constant 0 : index
    %c0_145 = arith.constant 0 : index
    %c0_146 = arith.constant 0 : index
    %164 = vector.load %arg6[%c0_144, %c0_145, %c0_146] : memref<4x2x3xbf16, #tpu.memory_space<vmem>>, vector<1x2x3xbf16>
    %165 = vector.shape_cast %164 : vector<1x2x3xbf16> to vector<2x3xbf16>
    %cst_147 = arith.constant dense<0.000000e+00> : vector<2x192xf32>
    %166 = tpu.matmul %165, %162, %cst_147 {dimension_numbers = #tpu.dot_dimension_numbers<[1], [0], [0], [1], [0, 0, 1, 1], [], []>} : vector<2x3xbf16>, vector<3x192xbf16>, vector<2x192xf32> -> vector<2x192xf32>
    %167 = arith.truncf %166 : vector<2x192xf32> to vector<2x192xbf16>
    %c0_148 = arith.constant 0 : index
    %c0_149 = arith.constant 0 : index
    %c0_150 = arith.constant 0 : index
    %168 = vector.load %arg11[%c0_148, %c0_149, %c0_150] : memref<4x192x128xbf16, #tpu.memory_space<vmem>>, vector<1x192x128xbf16>
    %169 = vector.shape_cast %168 : vector<1x192x128xbf16> to vector<192x128xbf16>
    %cst_151 = arith.constant dense<0.000000e+00> : vector<2x128xf32>
    %170 = tpu.matmul %167, %169, %cst_151 {dimension_numbers = #tpu.dot_dimension_numbers<[1], [0], [0], [1], [0, 0, 1, 1], [], []>} : vector<2x192xbf16>, vector<192x128xbf16>, vector<2x128xf32> -> vector<2x128xf32>
    %171 = vector.broadcast %163 : vector<1x128xf32> to vector<2x128xf32>
    %172 = arith.addf %171, %170 : vector<2x128xf32>
    %c1_152 = arith.constant 1 : index
    %c0_153 = arith.constant 0 : index
    %c0_154 = arith.constant 0 : index
    %173 = vector.load %arg6[%c1_152, %c0_153, %c0_154] : memref<4x2x3xbf16, #tpu.memory_space<vmem>>, vector<1x2x3xbf16>
    %174 = vector.shape_cast %173 : vector<1x2x3xbf16> to vector<2x3xbf16>
    %cst_155 = arith.constant dense<0.000000e+00> : vector<2x192xf32>
    %175 = tpu.matmul %174, %162, %cst_155 {dimension_numbers = #tpu.dot_dimension_numbers<[1], [0], [0], [1], [0, 0, 1, 1], [], []>} : vector<2x3xbf16>, vector<3x192xbf16>, vector<2x192xf32> -> vector<2x192xf32>
    %176 = arith.truncf %175 : vector<2x192xf32> to vector<2x192xbf16>
    %c1_156 = arith.constant 1 : index
    %c0_157 = arith.constant 0 : index
    %c0_158 = arith.constant 0 : index
    %177 = vector.load %arg11[%c1_156, %c0_157, %c0_158] : memref<4x192x128xbf16, #tpu.memory_space<vmem>>, vector<1x192x128xbf16>
    %178 = vector.shape_cast %177 : vector<1x192x128xbf16> to vector<192x128xbf16>
    %cst_159 = arith.constant dense<0.000000e+00> : vector<2x128xf32>
    %179 = tpu.matmul %176, %178, %cst_159 {dimension_numbers = #tpu.dot_dimension_numbers<[1], [0], [0], [1], [0, 0, 1, 1], [], []>} : vector<2x192xbf16>, vector<192x128xbf16>, vector<2x128xf32> -> vector<2x128xf32>
    %180 = arith.addf %172, %179 : vector<2x128xf32>
    %c2_160 = arith.constant 2 : index
    %c0_161 = arith.constant 0 : index
    %c0_162 = arith.constant 0 : index
    %181 = vector.load %arg6[%c2_160, %c0_161, %c0_162] : memref<4x2x3xbf16, #tpu.memory_space<vmem>>, vector<1x2x3xbf16>
    %182 = vector.shape_cast %181 : vector<1x2x3xbf16> to vector<2x3xbf16>
    %cst_163 = arith.constant dense<0.000000e+00> : vector<2x192xf32>
    %183 = tpu.matmul %182, %162, %cst_163 {dimension_numbers = #tpu.dot_dimension_numbers<[1], [0], [0], [1], [0, 0, 1, 1], [], []>} : vector<2x3xbf16>, vector<3x192xbf16>, vector<2x192xf32> -> vector<2x192xf32>
    %184 = arith.truncf %183 : vector<2x192xf32> to vector<2x192xbf16>
    %c2_164 = arith.constant 2 : index
    %c0_165 = arith.constant 0 : index
    %c0_166 = arith.constant 0 : index
    %185 = vector.load %arg11[%c2_164, %c0_165, %c0_166] : memref<4x192x128xbf16, #tpu.memory_space<vmem>>, vector<1x192x128xbf16>
    %186 = vector.shape_cast %185 : vector<1x192x128xbf16> to vector<192x128xbf16>
    %cst_167 = arith.constant dense<0.000000e+00> : vector<2x128xf32>
    %187 = tpu.matmul %184, %186, %cst_167 {dimension_numbers = #tpu.dot_dimension_numbers<[1], [0], [0], [1], [0, 0, 1, 1], [], []>} : vector<2x192xbf16>, vector<192x128xbf16>, vector<2x128xf32> -> vector<2x128xf32>
    %188 = arith.addf %180, %187 : vector<2x128xf32>
    %c3_168 = arith.constant 3 : index
    %c0_169 = arith.constant 0 : index
    %c0_170 = arith.constant 0 : index
    %189 = vector.load %arg6[%c3_168, %c0_169, %c0_170] : memref<4x2x3xbf16, #tpu.memory_space<vmem>>, vector<1x2x3xbf16>
    %190 = vector.shape_cast %189 : vector<1x2x3xbf16> to vector<2x3xbf16>
    %cst_171 = arith.constant dense<0.000000e+00> : vector<2x192xf32>
    %191 = tpu.matmul %190, %162, %cst_171 {dimension_numbers = #tpu.dot_dimension_numbers<[1], [0], [0], [1], [0, 0, 1, 1], [], []>} : vector<2x3xbf16>, vector<3x192xbf16>, vector<2x192xf32> -> vector<2x192xf32>
    %192 = arith.truncf %191 : vector<2x192xf32> to vector<2x192xbf16>
    %c3_172 = arith.constant 3 : index
    %c0_173 = arith.constant 0 : index
    %c0_174 = arith.constant 0 : index
    %193 = vector.load %arg11[%c3_172, %c0_173, %c0_174] : memref<4x192x128xbf16, #tpu.memory_space<vmem>>, vector<1x192x128xbf16>
    %194 = vector.shape_cast %193 : vector<1x192x128xbf16> to vector<192x128xbf16>
    %cst_175 = arith.constant dense<0.000000e+00> : vector<2x128xf32>
    %195 = tpu.matmul %192, %194, %cst_175 {dimension_numbers = #tpu.dot_dimension_numbers<[1], [0], [0], [1], [0, 0, 1, 1], [], []>} : vector<2x192xbf16>, vector<192x128xbf16>, vector<2x128xf32> -> vector<2x128xf32>
    %196 = arith.addf %188, %195 : vector<2x128xf32>
    %c0_176 = arith.constant 0 : index
    %c0_177 = arith.constant 0 : index
    %c0_178 = arith.constant 0 : index
    %197 = vector.load %arg17[%c0_176, %c0_177, %c0_178] : memref<1x2x128xf32, #tpu.memory_space<vmem>>, vector<1x2x128xf32>
    %198 = vector.shape_cast %197 : vector<1x2x128xf32> to vector<2x128xf32>
    %199 = vector.shape_cast %196 : vector<2x128xf32> to vector<1x2x128xf32>
    tpu.vector_store %arg17[%c0_176, %c0_177, %c0_178], %199 {strides = array<i32>} : memref<1x2x128xf32, #tpu.memory_space<vmem>>, vector<1x2x128xf32>,
    return
  }
  func.func @transform_0(%arg0: i32) -> (i32, i32, i32) {
    %c0_i32 = arith.constant 0 : i32
    %c0_i32_0 = arith.constant 0 : i32
    %c0_i32_1 = arith.constant 0 : i32
    return %arg0, %c0_i32, %c0_i32_0 : i32, i32, i32
  }
  func.func @transform_1(%arg0: i32) -> (i32, i32, i32) {
    %c0_i32 = arith.constant 0 : i32
    %c0_i32_0 = arith.constant 0 : i32
    %c0_i32_1 = arith.constant 0 : i32
    %c0_i32_2 = arith.constant 0 : i32
    return %c0_i32, %c0_i32_0, %c0_i32_1 : i32, i32, i32
  }
  func.func @transform_2(%arg0: i32) -> (i32, i32, i32) {
    %c0_i32 = arith.constant 0 : i32
    %c0_i32_0 = arith.constant 0 : i32
    %c0_i32_1 = arith.constant 0 : i32
    %c0_i32_2 = arith.constant 0 : i32
    return %c0_i32, %c0_i32_0, %c0_i32_1 : i32, i32, i32
  }
  func.func @transform_3(%arg0: i32) -> (i32, i32, i32) {
    %c0_i32 = arith.constant 0 : i32
    %c0_i32_0 = arith.constant 0 : i32
    %c0_i32_1 = arith.constant 0 : i32
    %c0_i32_2 = arith.constant 0 : i32
    return %c0_i32, %c0_i32_0, %c0_i32_1 : i32, i32, i32
  }
  func.func @transform_4(%arg0: i32) -> (i32, i32, i32) {
    %c0_i32 = arith.constant 0 : i32
    %c0_i32_0 = arith.constant 0 : i32
    %c0_i32_1 = arith.constant 0 : i32
    %c0_i32_2 = arith.constant 0 : i32
    return %c0_i32, %c0_i32_0, %c0_i32_1 : i32, i32, i32
  }
  func.func @transform_5(%arg0: i32) -> (i32, i32, i32) {
    %c0_i32 = arith.constant 0 : i32
    %c0_i32_0 = arith.constant 0 : i32
    %c0_i32_1 = arith.constant 0 : i32
    %c0_i32_2 = arith.constant 0 : i32
    return %c0_i32, %c0_i32_0, %c0_i32_1 : i32, i32, i32
  }
  func.func @transform_6(%arg0: i32) -> (i32, i32, i32) {
    %c0_i32 = arith.constant 0 : i32
    %c0_i32_0 = arith.constant 0 : i32
    %c0_i32_1 = arith.constant 0 : i32
    %c0_i32_2 = arith.constant 0 : i32
    return %c0_i32, %c0_i32_0, %c0_i32_1 : i32, i32, i32
  }
  func.func @transform_7(%arg0: i32) -> (i32, i32, i32) {
    %c0_i32 = arith.constant 0 : i32
    %c0_i32_0 = arith.constant 0 : i32
    %c0_i32_1 = arith.constant 0 : i32
    %c0_i32_2 = arith.constant 0 : i32
    return %c0_i32, %c0_i32_0, %c0_i32_1 : i32, i32, i32
  }
  func.func @transform_8(%arg0: i32) -> (i32, i32, i32) {
    %c0_i32 = arith.constant 0 : i32
    %c0_i32_0 = arith.constant 0 : i32
    %c0_i32_1 = arith.constant 0 : i32
    %c0_i32_2 = arith.constant 0 : i32
    return %c0_i32, %c0_i32_0, %c0_i32_1 : i32, i32, i32
  }
  func.func @transform_9(%arg0: i32) -> (i32, i32, i32) {
    %c0_i32 = arith.constant 0 : i32
    %c0_i32_0 = arith.constant 0 : i32
    %c0_i32_1 = arith.constant 0 : i32
    %c0_i32_2 = arith.constant 0 : i32
    return %c0_i32, %c0_i32_0, %c0_i32_1 : i32, i32, i32
  }
  func.func @transform_10(%arg0: i32) -> (i32, i32, i32) {
    %c0_i32 = arith.constant 0 : i32
    %c0_i32_0 = arith.constant 0 : i32
    %c0_i32_1 = arith.constant 0 : i32
    %c0_i32_2 = arith.constant 0 : i32
    return %c0_i32, %c0_i32_0, %c0_i32_1 : i32, i32, i32
  }
  func.func @transform_11(%arg0: i32) -> (i32, i32) {
    %c0_i32 = arith.constant 0 : i32
    %c0_i32_0 = arith.constant 0 : i32
    %c0_i32_1 = arith.constant 0 : i32
    return %c0_i32, %c0_i32_0 : i32, i32
  }
  func.func @transform_12(%arg0: i32) -> (i32, i32) {
    %c0_i32 = arith.constant 0 : i32
    %c0_i32_0 = arith.constant 0 : i32
    %c0_i32_1 = arith.constant 0 : i32
    return %c0_i32, %c0_i32_0 : i32, i32
  }
  func.func @transform_13(%arg0: i32) -> (i32, i32) {
    %c0_i32 = arith.constant 0 : i32
    %c0_i32_0 = arith.constant 0 : i32
    %c0_i32_1 = arith.constant 0 : i32
    return %c0_i32, %c0_i32_0 : i32, i32
  }
  func.func @transform_14(%arg0: i32) -> (i32, i32) {
    %c0_i32 = arith.constant 0 : i32
    %c0_i32_0 = arith.constant 0 : i32
    %c0_i32_1 = arith.constant 0 : i32
    return %c0_i32, %c0_i32_0 : i32, i32
  }
  func.func @transform_15(%arg0: i32) -> (i32, i32) {
    %c0_i32 = arith.constant 0 : i32
    %c0_i32_0 = arith.constant 0 : i32
    %c0_i32_1 = arith.constant 0 : i32
    return %c0_i32, %c0_i32_0 : i32, i32
  }
  func.func @transform_16(%arg0: i32) -> (i32, i32, i32) {
    %c0_i32 = arith.constant 0 : i32
    %c0_i32_0 = arith.constant 0 : i32
    %c0_i32_1 = arith.constant 0 : i32
    return %arg0, %c0_i32, %c0_i32_0 : i32, i32, i32
  }
}

</mosaic_0001>

<bundles_post_ra>
// kernel: forward.1
= control target key start
LH: loop header
LB: loop body
LE: loop exit
PB: predicated region body
PF: predicated region fallthrough
CT: control target
= control target key end

     0   :  { %s5030_s0 = inlined_call_operand.hbm [shape: f32[2,32,32], index: 0, kind: input, shape index: {}]   ;;  %s5031_s1 = inlined_call_operand.hbm [shape: bf16[4,16,32], index: 1, kind: input, shape index: {}]   ;;  %s5032_s2 = inlined_call_operand.hbm [shape: bf16[4,8,16], index: 2, kind: input, shape index: {}]   ;;  %s5033_s3 = inlined_call_operand.hbm [shape: bf16[4,4,8], index: 3, kind: input, shape index: {}]   ;;  %s5034_s4 = inlined_call_operand.hbm [shape: bf16[4,3,4], index: 4, kind: input, shape index: {}]   ;;  %s5035_s5 = inlined_call_operand.vmem [shape: bf16[4,2,3], index: 5, kind: input, shape index: {}]   ;;  %s5036_s6 = inlined_call_operand.hbm [shape: bf16[4,32,128], index: 6, kind: input, shape index: {}]   ;;  %s5037_s7 = inlined_call_operand.hbm [shape: bf16[4,128,128], index: 7, kind: input, shape index: {}]   ;;  %s5038_s8 = inlined_call_operand.hbm [shape: bf16[4,128,128], index: 8, kind: input, shape index: {}]   ;;  %s5039_s9 = inlined_call_operand.hbm [shape: bf16[4,128,192], index: 9, kind: input, shape index: {}]   ;;  %s5040_s10 = inlined_call_operand.hbm [shape: bf16[4,192,128], index: 10, kind: input, shape index: {}]   ;;  %s5041_s11 = inlined_call_operand.vmem [shape: f32[1,128], index: 11, kind: input, shape index: {}]   ;;  %s5042_s12 = inlined_call_operand.vmem [shape: f32[1,128], index: 12, kind: input, shape index: {}]   ;;  %s5043_s13 = inlined_call_operand.vmem [shape: f32[1,128], index: 13, kind: input, shape index: {}]   ;;  %s5044_s14 = inlined_call_operand.vmem [shape: f32[1,192], index: 14, kind: input, shape index: {}]   ;;  %s5045_s15 = inlined_call_operand.vmem [shape: f32[1,128], index: 15, kind: input, shape index: {}]   ;;  %s5046_s16 = inlined_call_operand.vmem [shape: f32[2,2,128], index: 16, kind: output, shape index: {}]  }
   0x1   :  { %5052 = sst [smem:[#allocation24_spill]] %s5030_s0 }
   0x2   :  { %5053 = sst [smem:[#allocation25_spill]] %s5031_s1 }
   0x3   :  { %5054 = sst [smem:[#allocation26_spill]] %s5032_s2 }
   0x4   :  { %5055 = sst [smem:[#allocation27_spill]] %s5033_s3 }
   0x5   :  { %5056 = sst [smem:[#allocation28_spill]] %s5034_s4 }
   0x6   :  { %5057 = sst [smem:[#allocation29_spill]] %s5035_s5 }
   0x7   :  { %5058 = sst [smem:[#allocation30_spill]] %s5044_s14 }
   0x8   :  { %5059 = sst [smem:[#allocation31_spill]] %s5045_s15 }
   0x9   :  { %5060 = sst [smem:[#allocation32_spill]] %s5046_s16 }
   0xa   :  { %21 = vsyncpa [#allocation3], 0 }
   0xb   :  { %23 = vsyncpa [#allocation3 + $0x1], 0 }
   0xc   :  { %24 = vsyncpa [#allocation5], 0 }
   0xd   :  { %25 = vsyncpa [#allocation8], 0 }
   0xe   :  { %26 = vsyncpa [#allocation11], 0 }
   0xf   :  { %27 = vsyncpa [#allocation14], 0 }
  0x10   :  { %28 = vsyncpa [#allocation17], 0  ;;  %s4759_s21 = smov 0   ;;  %s4761_s22 = smov 0  }
  0x11   :  { %s4763_s23 = smov 0   ;;  %s4765_s24 = smov 0  }
  0x12 LB: > { %s5061_s1 = sld [smem:[#allocation25_spill]]  ;;  %s4783_s28 = sadd.s32 4294967295, %s4656_s24   ;;  %s4656_s24 = sphi %s4765_s24, %s5080_s24   ;;  %s4652_s23 = sphi %s4763_s23, %s5079_s23   ;;  %s4648_s22 = sphi %s4761_s22, %s5078_s22   ;;  %s4644_s21 = sphi %s4759_s21, %s5077_s21  }
  0x13   : > { %p3157_p0 = scmp.ge.s32.totalorder %s4656_s24, 1  ;;  %p55_p1 = scmp.eq.s32.totalorder %s4783_s28, 0 }
  0x14   : > { %p406_p2 = scmp.lt.s32.totalorder %s4656_s24, 3  ;;  %s4658_s30 = smov [#allocation4]  }
  0x15   : > { %s419_s0 = sshll.u32 %s4658_s30, 4  ;;  %s5063_s3 = sld [smem:[#allocation27_spill]]  ;;  %s420_s0 = int_to_ptr.vmem [resolvable:$true] %s419_s0 }
  0x16   : > { %p4788_p3 = pnand %p3157_p0, %p406_p2  ;;  %s4659_s25 = smov [#allocation7]  }
  0x17   : > { %s447_s26 = sshll.u32 %s4659_s25, 4  ;;  %s4661_s30 = smov 4   ;;  %s448_s26 = int_to_ptr.vmem [resolvable:$true] %s447_s26 }
  0x18   : > { %s417_s27 = sshll.u32 %s5061_s1, 4  ;;  %p4199_p4 = pneg %p4788_p3  ;;  %s418_s27 = int_to_ptr.hbm [resolvable:$true] %s417_s27 }
  0x19   : > { %s4660_s1 = smov 64   ;;  %s5049_s17 = smov 32  }
  0x1a   : > { %p4799_p5 = pnand %p4199_p4, %p55_p1  ;;  %s5050_s18 = smov 2  }
  0x1b   : > { %s445_s19 = sshll.u32 %s5063_s3, 4  ;;  %s476_s25 = sshll.u32 %s5036_s6, 4  ;;  %s446_s19 = int_to_ptr.hbm [resolvable:$true] %s445_s19  ;;  %s477_s25 = int_to_ptr.hbm [resolvable:$true] %s476_s25 }
  0x1c   : > { %4202 = dma.hbm_to_vmem [thread:$0]  (!%p4799_p5), %s418_s27, 512, %s420_s0, [#allocation5], %s4660_s1, %s4660_s1, %s4661_s30  }
  0x1d   : > { %4208 = dma.hbm_to_vmem [thread:$0]  (!%p4799_p5), %s446_s19, 128, %s448_s26, [#allocation8], %s5049_s17, %s5049_s17, %s5050_s18  }
  0x1e   : > { %s4664_s15 = smov [#allocation10]   ;;  %s504_s0 = sshll.u32 %s5038_s8, 4  ;;  %s505_s0 = int_to_ptr.hbm [resolvable:$true] %s504_s0 }
  0x1f   : > { %s478_s5 = sshll.u32 %s4664_s15, 4  ;;  %s4665_s19 = smov [#allocation13]   ;;  %s479_s5 = int_to_ptr.vmem [resolvable:$true] %s478_s5 }
  0x20   : > { %4214 = dma.hbm_to_vmem [thread:$0]  (!%p4799_p5), %s477_s25, 1024, %s479_s5, [#allocation11], %s4660_s1, %s4660_s1, %s4661_s30  }
  0x21   : > { %s506_s26 = sshll.u32 %s4665_s19, 4  ;;  %s5065_s2 = sld [smem:[#allocation26_spill]]  ;;  %s507_s26 = int_to_ptr.vmem [resolvable:$true] %s506_s26 }
  0x22   : > { %4220 = dma.hbm_to_vmem [thread:$0]  (!%p4799_p5), %s505_s0, 4096, %s507_s26, [#allocation14], %s4660_s1, %s4660_s1, %s4661_s30  }
  0x23   : > { %s5066_s4 = sld [smem:[#allocation28_spill]]  ;;  %s4666_s5 = smov [#allocation6]  }
  0x24   : > { %s433_s25 = sshll.u32 %s4666_s5, 4  ;;  %s4667_s17 = smov [#allocation9]   ;;  %s434_s25 = int_to_ptr.vmem [resolvable:$true] %s433_s25 }
  0x25   : > { %s461_s19 = sshll.u32 %s4667_s17, 4  ;;  %s490_s0 = sshll.u32 %s5037_s7, 4  ;;  %s462_s19 = int_to_ptr.vmem [resolvable:$true] %s461_s19  ;;  %s491_s0 = int_to_ptr.hbm [resolvable:$true] %s490_s0 }
  0x26   : > { %s5067_s26 = smov 2   ;;  %s5068_s14 = smov 32  }
  0x27   : > { %s431_s16 = sshll.u32 %s5065_s2, 4  ;;  %s518_s2 = sshll.u32 %s5039_s9, 4  ;;  %s432_s16 = int_to_ptr.hbm [resolvable:$true] %s431_s16  ;;  %s519_s2 = int_to_ptr.hbm [resolvable:$true] %s518_s2 }
  0x28   : > { %4205 = dma.hbm_to_vmem [thread:$0]  (!%p4799_p5), %s432_s16, 256, %s434_s25, [#allocation5], %s4660_s1, %s4660_s1, %s4661_s30  }
  0x29   : > { %s459_s27 = sshll.u32 %s5066_s4, 4  ;;  %s4668_s4 = smov [#allocation12]   ;;  %s460_s27 = int_to_ptr.hbm [resolvable:$true] %s459_s27 }
  0x2a   : > { %4211 = dma.hbm_to_vmem [thread:$0]  (!%p4799_p5), %s460_s27, 128, %s462_s19, [#allocation8], %s5068_s14, %s5068_s14, %s5067_s26  }
  0x2b   : > { %s492_s16 = sshll.u32 %s4668_s4, 4  ;;  %s4669_s18 = smov [#allocation15]   ;;  %s493_s16 = int_to_ptr.vmem [resolvable:$true] %s492_s16 }
  0x2c   : > { %4217 = dma.hbm_to_vmem [thread:$0]  (!%p4799_p5), %s491_s0, 4096, %s493_s16, [#allocation11], %s4660_s1, %s4660_s1, %s4661_s30  }
  0x2d   : > { %s520_s27 = sshll.u32 %s4669_s18, 4  ;;  %s5051_s25 = smov 128   ;;  %s521_s27 = int_to_ptr.vmem [resolvable:$true] %s520_s27 }
  0x2e   : > { %s4671_s4 = smov 8   ;;  %s532_s3 = sshll.u32 %s5040_s10, 4  ;;  %s533_s3 = int_to_ptr.hbm [resolvable:$true] %s532_s3 }
  0x2f   : > { %4223 = dma.hbm_to_vmem [thread:$0]  (!%p4799_p5), %s519_s2, 8192, %s521_s27, [#allocation14], %s5051_s25, %s5051_s25, %s4671_s4  }
  0x30   : > { %s4672_s0 = smov [#allocation16]   ;;  %s4870_s14 = sadd.s32 1, %s4656_s24  }
  0x31   : > { %s534_s26 = sshll.u32 %s4672_s0, 4  ;;  %s38_s2 = ssub.s32 %s4656_s24, %s4870_s14  ;;  %s535_s26 = int_to_ptr.vmem [resolvable:$true] %s534_s26 }
  0x32   : > { %4226 = dma.hbm_to_vmem [thread:$0]  (!%p4799_p5), %s533_s3, 6144, %s535_s26, [#allocation17], %s4660_s1, %s4660_s1, %s4661_s30  }
  0x33   : > { %s41_s15 = sadd.s32 1, %s4652_s23  ;;  %p39_p6 = scmp.eq.s32.totalorder %s38_s2, 0 }
  0x34   : > { %p48_p7 = scmp.ne.s32.totalorder %s4652_s23, %s4648_s22  ;;  %p49_p8 = scmp.eq.s32.totalorder %s4656_s24, 0 }
  0x35   : > { %p54_p9 = scmp.ne.s32.totalorder %s4648_s22, %s4644_s21  ;;  %p4240_p12 = scmp.lt.s32.totalorder %s4656_s24, 2 }
  0x36   : > { %s4881_s5 = scalar_select %p39_p6, %s4652_s23, %s41_s15  }
  0x37   : > { %p50_p10 = por %p49_p8, %p48_p7  ;;  %p4885_p11 = por %p55_p1, %p54_p9 }
  0x38   : > { %s563_s20 = sand.u32 1, %s4652_s23   ;;  %s3972_s30 = sshll.u32 %s4656_s24, 5 }
  0x39   : > { %s3168_s1 = sshll.u32 %s563_s20, 5  ;;  %s5070_s17 = sld [smem:[#allocation24_spill]] }
  0x3a   : > { %s567_s3 = scalar_lea.vmem [#allocation2], %s3168_s1  ;;  %p4895_p13 = pnand %p4240_p12, %p50_p10 }
  0x3b   : > { %s575_s0 = sshll.u32 %s567_s3, 4  ;;  %s564_s2 = scalar_lea.sflag [#allocation3], %s563_s20  ;;  %s576_s0 = int_to_ptr.vmem [resolvable:$true] %s575_s0 }
  0x3c   : > { %p4576_p2 = pneg %p4895_p13 }
  0x3f   : > { %s572_s19 = scalar_lea.hbm %s5070_s17, %s3972_s30  ;;  %s4579_s30 = scalar_lea.hbm %s5070_s17, 64 }
  0x40   : > { %s573_s26 = sshll.u32 %s572_s19, 4  ;;  %s574_s26 = int_to_ptr.hbm [resolvable:$true] %s573_s26 }
  0x41   : > { %s4572_s15 = sshra.s32 %s574_s26, 4  ;;  %s4573_s15 = int_to_ptr.hbm [resolvable:$true] %s4572_s15 }
  0x42   : > { %s4574_s25 = scalar_lea.hbm %s4573_s15, 32  ;;  %p4580_p6 = scmp.lt.s32.totalorder %s4573_s15, %s5070_s17 }
  0x43   : > { %p4575_p0 = scmp.ne.s32.totalorder %s4573_s15, %s4574_s25  ;;  %p4581_p7 = scmp.lt.s32.totalorder %s4579_s30, %s4574_s25 }
  0x45   : > { %p4577_p4 = pnand %p4576_p2, %p4575_p0  ;;  %p4582_p8 = por %p4581_p7, %p4580_p6 }
  0x47   : > { %p4578_p5 = pneg %p4577_p4 }
  0x49   : > { %p4583_p9 = pnand %p4582_p8, %p4578_p5 }
  0x4b   : > { %4586 = shalt.err (!%p4583_p9)
}
  0x4c   : > { %s5072_s20 = smov 128   ;;  %587 = sbr.rel (%p4788_p3) target bundleno = 2004 (0x7d4), region = 84 }
  0x4d   : > { %4230 = dma.hbm_to_vmem [thread:$0]  (!%p4895_p13), %s574_s26, 512, %s576_s0, %s564_s2, %s5072_s20, %s5072_s20, %s4671_s4  }
  0x4e   : > { %s589_s19 = sand.u32 (!%p4788_p3), 1, %s4648_s22  }
  0x4f   : > { %s3172_s3 = sshll.u32 (!%p4788_p3), %s589_s19, 5  ;;  %s590_s24 = scalar_lea.sflag (!%p4788_p3), [#allocation3], %s589_s19 }
  0x50   : > { %s593_s1 = scalar_lea.vmem (!%p4788_p3), [#allocation2], %s3172_s3 }
  0x51   : > { %4619 = dma.done.wait (%p4885_p11), %s590_s24, 512  }
  0x52   : > { %4621 = vsyncadd (%p4885_p11), %s590_s24, 4294966784 }
  0x53   : > { %4623 = dma.done.wait (%p55_p1), [#allocation5], 768  }
  0x54   : > { %4625 = vsyncadd (%p55_p1), [#allocation5], 4294966528 }
  0x55   : > { %4627 = dma.done.wait (%p55_p1), [#allocation8], 256  }
  0x56   : > { %4629 = vsyncadd (%p55_p1), [#allocation8], 4294967040 }
  0x57   : > { %4631 = dma.done.wait (%p55_p1), [#allocation11], 5120  }
  0x58   : > { %4633 = vsyncadd (%p55_p1), [#allocation11], 4294962176 }
  0x59   : > { %4635 = dma.done.wait (%p55_p1), [#allocation14], 12288  }
  0x5a   : > { %4637 = vsyncadd (%p55_p1), [#allocation14], 4294955008 }
  0x5b   : > { %4639 = dma.done.wait (%p55_p1), [#allocation17], 6144  }
  0x5c   : > { %4641 = vsyncadd (%p55_p1), [#allocation17], 4294961152  ;;  %v694_v0 = vld [vmem:[%s593_s1 + $0x10] sm:$0xff]  ;;  %v695_v1 = vld [vmem:[%s593_s1 + $0x18] sm:$0xff]  ;;  %vm706_vm0 = vcmask 261120   ;;  %vm958_vm3 = vcmask 130048  }
  0x5d   : > { %v692_v2 = vld [vmem:[%s593_s1] sm:$0xff]  ;;  %v697_v3 = vpack.c.bf16 %v695_v1, %v694_v0  ;;  %v693_v4 = vld [vmem:[%s593_s1 + $0x8] sm:$0xff]  ;;  %v3982_v8 = vld [vmem:[#allocation4 + $0x18] sm:$0xff]  ;;  %vm1361_vm5 = vcmask 1043456   ;;  %vm1357_vm6 = vcmask 64512   ;;  %vm1764_vm8 = vcmask 1041408  }
  0x5e   : > { %v696_v5 = vpack.c.bf16 %v693_v4, %v692_v2  ;;  %v3973_v6 = vld [vmem:[#allocation4] sm:$0xff]  ;;  %v3976_v7 = vld [vmem:[#allocation4 + $0x8] sm:$0xff]  ;;  %v3979_v9 = vld [vmem:[#allocation4 + $0x10] sm:$0xff]  ;;  %vm1760_vm9 = vcmask 31744   ;;  %s5073_s15 = sld [smem:[#allocation30_spill]]  ;;  %vm2357_vm10 = vcmask 1040384  }
  0x5f   : > { %716 = vmatpush.bf16.msra.mxu0 %v697_v3  ;;  %780 = vmatpush.bf16.msra.mxu2 %v697_v3  ;;  %v3975_v10 = vld [vmem:[#allocation10 + $0x8] sm:$0xff]  ;;  %v3974_v11 = vld [vmem:[#allocation10] sm:$0xff]  ;;  %v3978_v12 = vld [vmem:[#allocation10 + $0x18] sm:$0xff]  ;;  %s5074_s27 = sld [smem:[#allocation29_spill]]  ;;  %vm2353_vm13 = vcmask 23552   ;;  %vm2490_vm14 = vcmask 523264  }
  0x60   : > { %750 = vmatpush.bf16.msra.mxu3 %v3975_v10  ;;  %v3981_v13 = vld [vmem:[#allocation10 + $0x28] sm:$0xff]  ;;  %v3977_v14 = vld [vmem:[#allocation10 + $0x10] sm:$0xff]  ;;  %v3980_v15 = vld [vmem:[#allocation10 + $0x20] sm:$0xff]  ;;  %s5075_s16 = sld [smem:[#allocation31_spill]]  ;;  %p687_p1 = scmp.lt.s32.totalorder %s4783_s28, 1 }
  0x61   : > { %877 = vmatpush.bf16.msra.mxu1 %v3981_v13  ;;  %v3984_v19 = vld [vmem:[#allocation10 + $0x38] sm:$0xff]  ;;  %v3983_v21 = vld [vmem:[#allocation10 + $0x30] sm:$0xff]  ;;  %v4298_v34 = vld [vmem:[%s5041_s11] ss:$0 sm:$0xff]  ;;  %s5076_s2 = sld [smem:[#allocation32_spill]] }
  0x62   : > { %v957_v52 = vld [vmem:[#allocation6] sm:$0xf]  ;;  %v1058_v53 = vld [vmem:[#allocation6 + $0x4] sm:$0xf]  ;;  %v3992_v54 = vld [vmem:[#allocation12 + $0x38] sm:$0xff]  ;;  %s5082_s28 = smov (!%p687_p1, %s4783_s28), 1 }
  0x63   : > { %717 = vmatpush.bf16.msra.mxu0 %v696_v5  ;;  %781 = vmatpush.bf16.msra.mxu2 %v696_v5  ;;  %v4000_v55 = vld [vmem:[#allocation12 + $0x78] sm:$0xff]  ;;  %v3991_v56 = vld [vmem:[#allocation12 + $0x30] sm:$0xff]  ;;  %v3990_v60 = vld [vmem:[#allocation12 + $0x28] sm:$0xff]  ;;  %s3182_s0 = sshll.u32 %s5082_s28, 1 }
  0x64   : > { %751 = vmatpush.bf16.msra.mxu3 %v3974_v11  ;;  %v3999_v57 = vld [vmem:[#allocation12 + $0x70] sm:$0xff]  ;;  %v4008_v58 = vld [vmem:[#allocation12 + $0xb8] sm:$0xff]  ;;  %v3998_v61 = vld [vmem:[#allocation12 + $0x68] sm:$0xff] }
  0x65   : > { %878 = vmatpush.bf16.msra.mxu1 %v3980_v15  ;;  %v4007_v59 = vld [vmem:[#allocation12 + $0xb0] sm:$0xff]  ;;  %v4006_v62 = vld [vmem:[#allocation12 + $0xa8] sm:$0xff]  ;;  %v3989_v63 = vld [vmem:[#allocation12 + $0x20] sm:$0xff] }
  0x66   : > { %3187 = vmatmul.msk.bf16.vlgmr.msra.gmra.mxu0 %vm706_vm0, %v3973_v6  ;;  %3201 = vmatmul.msk.bf16.vlgmr.msra.gmra.mxu2 %vm706_vm0, %v3976_v7  ;;  %v3997_v0 = vld [vmem:[#allocation12 + $0x60] sm:$0xff]  ;;  %v1156_v1 = vld [vmem:[#allocation6 + $0x8] sm:$0xf]  ;;  %v3988_v2 = vld [vmem:[#allocation12 + $0x18] sm:$0xff] }
  0x67   : > { %904 = vmatpush.bf16.msrb.mxu2 %v697_v3  ;;  %842 = vmatpush.bf16.msrb.mxu0 %v697_v3  ;;  %v3996_v3 = vld [vmem:[#allocation12 + $0x58] sm:$0xff]  ;;  %v3987_v4 = vld [vmem:[#allocation12 + $0x10] sm:$0xff]  ;;  %v3986_v6 = vld [vmem:[#allocation12 + $0x8] sm:$0xff] }
  0x68   : > { %815 = vmatpush.bf16.msrb.mxu3 %v3978_v12  ;;  %v1254_v7 = vld [vmem:[#allocation6 + $0xc] sm:$0xf]  ;;  %v4004_v11 = vld [vmem:[#allocation12 + $0x98] sm:$0xff]  ;;  %v3993_v13 = vld [vmem:[#allocation12 + $0x40] sm:$0xff] }
  0x69   : > { %1040 = vmatpush.bf16.msrb.mxu1 %v3992_v54  ;;  %v3994_v10 = vld [vmem:[#allocation12 + $0x48] sm:$0xff]  ;;  %v4016_v12 = vld [vmem:[#allocation12 + $0xf8] sm:$0xff]  ;;  %v4015_v15 = vld [vmem:[#allocation12 + $0xf0] sm:$0xff] }
  0x6b   : > { %905 = vmatpush.bf16.msrb.mxu2 %v696_v5  ;;  %843 = vmatpush.bf16.msrb.mxu0 %v696_v5  ;;  %v3995_v5 = vld [vmem:[#allocation12 + $0x50] sm:$0xff] }
  0x6c   : > { %816 = vmatpush.bf16.msrb.mxu3 %v3977_v14  ;;  %v4003_v14 = vld [vmem:[#allocation12 + $0x90] sm:$0xff] }
  0x6d   : > { %1041 = vmatpush.bf16.msrb.mxu1 %v3991_v56 }
  0x71   : > { %1042 = vmatpush.bf16.msrb.mxu1 %v3990_v60  ;;  %v4040_v60 = vld [vmem:[#allocation13 + $0xb8] sm:$0xff] }
  0x75   : > { %1043 = vmatpush.bf16.msrb.mxu1 %v3989_v63  ;;  %v1356_v63 = vld [vmem:[#allocation7] sm:$0x3] }
  0x76   : > { %3229 = vmatmul.msk.bf16.vlgmr.msrb.gmra.mxu2 %vm706_vm0, %v3982_v8  ;;  %3215 = vmatmul.msk.bf16.vlgmr.msrb.gmra.mxu0 %vm706_vm0, %v3979_v9  ;;  %v3985_v8 = vld [vmem:[#allocation12] sm:$0xff] }
  0x77   : > { %v4005_v9 = vld [vmem:[#allocation12 + $0xa0] sm:$0xff] }
  0x79   : > { %1044 = vmatpush.bf16.msrb.mxu1 %v3988_v2  ;;  %v4031_v2 = vld [vmem:[#allocation13 + $0x70] sm:$0xff] }
  0x7d   : > { %1045 = vmatpush.bf16.msrb.mxu1 %v3987_v4  ;;  %v4030_v4 = vld [vmem:[#allocation13 + $0x68] sm:$0xff] }
  0x81   : > { %1046 = vmatpush.bf16.msrb.mxu1 %v3986_v6  ;;  %v4029_v6 = vld [vmem:[#allocation13 + $0x60] sm:$0xff] }
  0x85   : > { %1047 = vmatpush.bf16.msrb.mxu1 %v3985_v8  ;;  %v4028_v8 = vld [vmem:[#allocation13 + $0x58] sm:$0xff] }
  0xe3   : > { %v719_v16 = vpop.f32.mrf.mxu0 }
  0xe9   : > { %v783_v18 = vpop.f32.mrf.mxu2 }
  0xeb   : > { %v721_v17 = vpop.f32.mrf.mxu0 }
  0xec   : > { %v724_v20 = vpack.c.bf16 %v721_v17, %v719_v16  ;;  %v4002_v16 = vld [vmem:[#allocation12 + $0x88] sm:$0xff] }
  0xed   : > { %v4014_v17 = vld [vmem:[#allocation12 + $0xe8] sm:$0xff] }
  0xee   : > { %3196 = vmatmul.msk.bf16.vlgmr.msra.gmra.mxu3 %vm706_vm0, %v724_v20  ;;  %v4012_v20 = vld [vmem:[#allocation12 + $0xd8] sm:$0xff] }
  0xef   : > { %939 = vmatpush.bf16.msra.mxu3 %v3984_v19  ;;  %v4013_v19 = vld [vmem:[#allocation12 + $0xe0] sm:$0xff] }
  0xf1   : > { %v785_v23 = vpop.f32.mrf.mxu2 }
  0xf2   : > { %v788_v25 = vpack.c.bf16 %v785_v23, %v783_v18  ;;  %v4001_v18 = vld [vmem:[#allocation12 + $0x80] sm:$0xff] }
  0xf3   : > { %v845_v22 = vpop.f32.mrf.mxu0  ;;  %940 = vmatpush.bf16.msra.mxu3 %v3983_v21  ;;  %v4011_v21 = vld [vmem:[#allocation12 + $0xd0] sm:$0xff]  ;;  %v4009_v23 = vld [vmem:[#allocation12 + $0xc0] sm:$0xff] }
  0xf9   : > { %v907_v27 = vpop.f32.mrf.mxu2 }
  0xfb   : > { %v847_v24 = vpop.f32.mrf.mxu0 }
  0xfc   : > { %v850_v26 = vpack.c.bf16 %v847_v24, %v845_v22  ;;  %v4010_v22 = vld [vmem:[#allocation12 + $0xc8] sm:$0xff] }
  0xfe   : > { %3210 = vmatmul.msk.bf16.vlgmr.msrb.gmra.mxu3 %vm706_vm0, %v788_v25  ;;  %3224 = vmatmul.msk.bf16.vlgmr.msra.gmra.mxu1 %vm706_vm0, %v850_v26 }
  0xff   : > { %1141 = vmatpush.bf16.msrb.mxu3 %v4000_v55  ;;  %1337 = vmatpush.bf16.msra.mxu1 %v4016_v12  ;;  %v4026_v12 = vld [vmem:[#allocation13 + $0x48] sm:$0xff] }
 0x101   : > { %v909_v28 = vpop.f32.mrf.mxu2 }
 0x102   : > { %v912_v29 = vpack.c.bf16 %v909_v28, %v907_v27 }
 0x103   : > { %1142 = vmatpush.bf16.msrb.mxu3 %v3999_v57  ;;  %1338 = vmatpush.bf16.msra.mxu1 %v4015_v15  ;;  %v4033_v15 = vld [vmem:[#allocation13 + $0x80] sm:$0xff] }
 0x107   : > { %1143 = vmatpush.bf16.msrb.mxu3 %v3998_v61  ;;  %1339 = vmatpush.bf16.msra.mxu1 %v4014_v17  ;;  %v4047_v17 = vld [vmem:[#allocation13 + $0xf0] sm:$0xff] }
 0x10b   : > { %1144 = vmatpush.bf16.msrb.mxu3 %v3997_v0  ;;  %1340 = vmatpush.bf16.msra.mxu1 %v4013_v19  ;;  %v1461_v0 = vld [vmem:[#allocation7 + $0x2] sm:$0x3] }
 0x10e   : > { %3238 = vmatmul.msk.bf16.vlgmr.msra.gmra.mxu3 %vm706_vm0, %v912_v29 }
 0x10f   : > { %1145 = vmatpush.bf16.msrb.mxu3 %v3996_v3  ;;  %1341 = vmatpush.bf16.msra.mxu1 %v4012_v20  ;;  %v4039_v3 = vld [vmem:[#allocation13 + $0xb0] sm:$0xff] }
 0x113   : > { %1146 = vmatpush.bf16.msrb.mxu3 %v3995_v5  ;;  %1342 = vmatpush.bf16.msra.mxu1 %v4011_v21  ;;  %v4038_v5 = vld [vmem:[#allocation13 + $0xa8] sm:$0xff] }
 0x117   : > { %1147 = vmatpush.bf16.msrb.mxu3 %v3994_v10  ;;  %1343 = vmatpush.bf16.msra.mxu1 %v4010_v22  ;;  %v4027_v10 = vld [vmem:[#allocation13 + $0x50] sm:$0xff] }
 0x11b   : > { %1148 = vmatpush.bf16.msrb.mxu3 %v3993_v13  ;;  %1344 = vmatpush.bf16.msra.mxu1 %v4009_v23  ;;  %v4034_v13 = vld [vmem:[#allocation13 + $0x88] sm:$0xff] }
 0x171   : > { %v753_v30 = vpop.f32.mrf.mxu3 }
 0x172   : > { %v761_v36 = vadd.f32 %v4298_v34, %v753_v30 }
 0x179   : > { %v755_v31 = vpop.f32.mrf.mxu3 }
 0x17a   : > { %v762_v39 = vadd.f32 %v4298_v34, %v755_v31 }
 0x17b   : > { %v880_v35 = vpop.f32.mrf.mxu1 }
 0x181   : > { %v818_v32 = vpop.f32.mrf.mxu3 }
 0x182   : > { %v823_v37 = vadd.f32 %v818_v32, %v761_v36  ;;  %v4024_v36 = vld [vmem:[#allocation13 + $0x38] sm:$0xff] }
 0x183   : > { %v882_v43 = vpop.f32.mrf.mxu1 }
 0x184   : > { %v885_v41 = vadd.f32 %v880_v35, %v823_v37  ;;  %v4023_v37 = vld [vmem:[#allocation13 + $0x30] sm:$0xff] }
 0x189   : > { %v820_v33 = vpop.f32.mrf.mxu3 }
 0x18a   : > { %v824_v40 = vadd.f32 %v820_v33, %v762_v39  ;;  %v4021_v39 = vld [vmem:[#allocation13 + $0x20] sm:$0xff] }
 0x18c   : > { %v886_v44 = vadd.f32 %v882_v43, %v824_v40  ;;  %v4020_v40 = vld [vmem:[#allocation13 + $0x18] sm:$0xff]  ;;  %v4018_v43 = vld [vmem:[#allocation13 + $0x8] sm:$0xff] }
 0x191   : > { %v942_v38 = vpop.f32.mrf.mxu3 }
 0x192   : > { %v947_v42 = vadd.f32 %v942_v38, %v885_v41  ;;  %v4022_v38 = vld [vmem:[#allocation13 + $0x28] sm:$0xff]  ;;  %v4019_v41 = vld [vmem:[#allocation13 + $0x10] sm:$0xff] }
 0x194   : > { %v951_v46 = vmul.f32 0.2, %v947_v42  ;;  %vm949_vm1 = vcmp.ge.f32.partialorder %v947_v42, 0.0 }
 0x196   : > { %v953_v49 = vsel %vm949_vm1, %v947_v42, %v951_v46 }
 0x199   : > { %v944_v45 = vpop.f32.mrf.mxu3 }
 0x19a   : > { %v948_v47 = vadd.f32 %v944_v45, %v886_v44  ;;  %v4017_v44 = vld [vmem:[#allocation13] sm:$0xff] }
 0x19c   : > { %vm950_vm2 = vcmp.ge.f32.partialorder %v948_v47, 0.0  ;;  %v952_v48 = vmul.f32 0.2, %v948_v47 }
 0x19e   : > { %v954_v50 = vsel %vm950_vm2, %v948_v47, %v952_v48 }
 0x19f   : > { %v955_v51 = vpack.c.bf16 %v954_v50, %v953_v49  ;;  %v4299_v49 = vld [vmem:[%s5042_s12] ss:$0 sm:$0xff] }
 0x1a1   : > { %969 = vmatpush.bf16.msra.mxu0 %v955_v51  ;;  %1069 = vmatpush.bf16.msra.mxu2 %v955_v51 }
 0x1a4   : > { %3239 = vmatmul.msk.bf16.vlgmr.msra.gmra.mxu0 %vm958_vm3, %v957_v52  ;;  %3272 = vmatmul.msk.bf16.vlgmr.msra.gmra.mxu2 %vm958_vm3, %v1058_v53 }
 0x1a5   : > { %1167 = vmatpush.bf16.msrb.mxu0 %v955_v51  ;;  %1239 = vmatpush.bf16.msrb.mxu2 %v4008_v58 }
 0x1a9   : > { %1265 = vmatpush.bf16.msra.mxu0 %v955_v51  ;;  %1240 = vmatpush.bf16.msrb.mxu2 %v4007_v59  ;;  %v4032_v59 = vld [vmem:[#allocation13 + $0x78] sm:$0xff] }
 0x1ad   : > { %1241 = vmatpush.bf16.msrb.mxu2 %v4006_v62 }
 0x1b1   : > { %1242 = vmatpush.bf16.msrb.mxu2 %v4005_v9  ;;  %v4036_v9 = vld [vmem:[#allocation13 + $0x98] sm:$0xff] }
 0x1b4   : > { %3305 = vmatmul.msk.bf16.vlgmr.msrb.gmra.mxu0 %vm958_vm3, %v1156_v1  ;;  %v1559_v1 = vld [vmem:[#allocation7 + $0x4] sm:$0x3] }
 0x1b5   : > { %1243 = vmatpush.bf16.msrb.mxu2 %v4004_v11  ;;  %1443 = vmatpush.bf16.msrb.mxu0 %v4024_v36  ;;  %v4035_v11 = vld [vmem:[#allocation13 + $0x90] sm:$0xff] }
 0x1b6   : > { %v3627_v36 = vld [vmem:[#allocation15 + $0xf0] sm:$0xf] }
 0x1b9   : > { %1244 = vmatpush.bf16.msrb.mxu2 %v4003_v14  ;;  %1444 = vmatpush.bf16.msrb.mxu0 %v4023_v37  ;;  %v4025_v14 = vld [vmem:[#allocation13 + $0x40] sm:$0xff] }
 0x1bd   : > { %1245 = vmatpush.bf16.msrb.mxu2 %v4002_v16  ;;  %1445 = vmatpush.bf16.msrb.mxu0 %v4022_v38  ;;  %v4048_v16 = vld [vmem:[#allocation13 + $0xf8] sm:$0xff] }
 0x1be   : > { %v4080_v38 = vld [vmem:[#allocation15 + $0xf4] sm:$0xf0] }
 0x1c1   : > { %1246 = vmatpush.bf16.msrb.mxu2 %v4001_v18  ;;  %1446 = vmatpush.bf16.msrb.mxu0 %v4021_v39  ;;  %v4046_v18 = vld [vmem:[#allocation13 + $0xe8] sm:$0xff]  ;;  %v3554_v39 = vld [vmem:[#allocation15 + $0x60] sm:$0xf] }
 0x1c4   : > { %3338 = vmatmul.msk.bf16.vlgmr.msra.gmra.mxu0 %vm958_vm3, %v1254_v7  ;;  %v4037_v7 = vld [vmem:[#allocation13 + $0xa0] sm:$0xff] }
 0x1c5   : > { %1447 = vmatpush.bf16.msrb.mxu0 %v4020_v40  ;;  %v4062_v40 = vld [vmem:[#allocation15 + $0x64] sm:$0xf0] }
 0x1c9   : > { %1448 = vmatpush.bf16.msrb.mxu0 %v4019_v41  ;;  %v3628_v41 = vor.u32 %v4080_v38, %v3627_v36  ;;  %v4059_v38 = vld [vmem:[#allocation15 + $0x54] sm:$0xf] }
 0x1cd   : > { %1449 = vmatpush.bf16.msrb.mxu0 %v4018_v43  ;;  %v4078_v43 = vld [vmem:[#allocation15 + $0xe4] sm:$0xf0] }
 0x1d1   : > { %1450 = vmatpush.bf16.msrb.mxu0 %v4017_v44  ;;  %v3555_v44 = vor.u32 %v4062_v40, %v3554_v39  ;;  %v3548_v39 = vld [vmem:[#allocation15 + $0x58] sm:$0xf0] }
 0x221   : > { %v971_v24 = vpop.f32.mrf.mxu0 }
 0x222   : > { %v975_v25 = vpack.c.bf16 %v971_v24, %v971_v24 }
 0x224   : > { %1048 = vmatmul.bf16.vlgmr.msrb.gmra.mxu1 %v975_v25 }
 0x227   : > { %v1071_v26 = vpop.f32.mrf.mxu2 }
 0x228   : > { %v1075_v27 = vpack.c.bf16 %v1071_v26, %v1071_v26 }
 0x229   : > { %v973_v28 = vpop.f32.mrf.mxu0 }
 0x22a   : > { %1149 = vmatmul.bf16.vlgmr.msrb.gmra.mxu3 %v1075_v27  ;;  %v1657_v28 = vld [vmem:[#allocation7 + $0x6] sm:$0x3] }
 0x22f   : > { %v1073_v29 = vpop.f32.mrf.mxu2 }
 0x230   : > { %v4045_v29 = vld [vmem:[#allocation13 + $0xe0] sm:$0xff] }
 0x231   : > { %v1169_v30 = vpop.f32.mrf.mxu0 }
 0x232   : > { %v1173_v31 = vpack.c.bf16 %v1169_v30, %v1169_v30  ;;  %v4044_v30 = vld [vmem:[#allocation13 + $0xd8] sm:$0xff] }
 0x234   : > { %1247 = vmatmul.bf16.vlgmr.msrb.gmra.mxu2 %v1173_v31  ;;  %v4043_v31 = vld [vmem:[#allocation13 + $0xd0] sm:$0xff] }
 0x239   : > { %v1171_v32 = vpop.f32.mrf.mxu0 }
 0x23a   : > { %v4042_v32 = vld [vmem:[#allocation13 + $0xc8] sm:$0xff] }
 0x241   : > { %v1267_v33 = vpop.f32.mrf.mxu0 }
 0x242   : > { %v1271_v34 = vpack.c.bf16 %v1267_v33, %v1267_v33  ;;  %v4041_v33 = vld [vmem:[#allocation13 + $0xc0] sm:$0xff] }
 0x244   : > { %1345 = vmatmul.bf16.vlgmr.msra.gmra.mxu1 %v1271_v34  ;;  %v3562_v34 = vld [vmem:[#allocation15 + $0x70] sm:$0xf] }
 0x249   : > { %v1269_v35 = vpop.f32.mrf.mxu0 }
 0x24a   : > { %v4064_v35 = vld [vmem:[#allocation15 + $0x74] sm:$0xf0] }
 0x24b   : > { %v3563_v37 = vor.u32 %v4064_v35, %v3562_v34  ;;  %v3556_v35 = vld [vmem:[#allocation15 + $0x68] sm:$0xf0] }
 0x2a1   : > { %v1049_v42 = vpop.f32.mrf.mxu1 }
 0x2a2   : > { %v1056_v50 = vadd.f32 %v4299_v49, %v1049_v42  ;;  %v3619_v42 = vld [vmem:[#allocation15 + $0xe0] sm:$0xf]  ;;  %v4076_v49 = vld [vmem:[#allocation15 + $0xd4] sm:$0xf0] }
 0x2a9   : > { %v1051_v45 = vpop.f32.mrf.mxu1 }
 0x2aa   : > { %v3620_v45 = vor.u32 %v4078_v43, %v3619_v42  ;;  %v3551_v42 = vor.u32 %v4059_v38, %v3548_v39  ;;  %v4057_v43 = vld [vmem:[#allocation15 + $0x44] sm:$0xf]  ;;  %v3676_v38 = vld [vmem:[#allocation15 + $0x150] sm:$0xf]  ;;  %v4092_v39 = vld [vmem:[#allocation15 + $0x154] sm:$0xf0] }
 0x2ad   : > { %v1150_v46 = vpop.f32.mrf.mxu3 }
 0x2ae   : > { %v1154_v51 = vadd.f32 %v1150_v46, %v1056_v50  ;;  %v3546_v46 = vld [vmem:[#allocation15 + $0x50] sm:$0xf] }
 0x2b5   : > { %v1152_v47 = vpop.f32.mrf.mxu3 }
 0x2b6   : > { %v4060_v47 = vld [vmem:[#allocation15 + $0x54] sm:$0xf0] }
 0x2b7   : > { %v1248_v48 = vpop.f32.mrf.mxu2  ;;  %v3547_v50 = vor.u32 %v4060_v47, %v3546_v46  ;;  %v4079_v47 = vld [vmem:[#allocation15 + $0xf4] sm:$0xf] }
 0x2b8   : > { %v1252_v53 = vadd.f32 %v1248_v48, %v1154_v51  ;;  %v3611_v48 = vld [vmem:[#allocation15 + $0xd0] sm:$0xf] }
 0x2bf   : > { %v1250_v52 = vpop.f32.mrf.mxu2 }
 0x2c0   : > { %v3612_v52 = vor.u32 %v4076_v49, %v3611_v48  ;;  %v3629_v48 = vld [vmem:[#allocation15 + $0xf8] sm:$0xf0] }
 0x2c1   : > { %v1346_v54 = vpop.f32.mrf.mxu1 }
 0x2c2   : > { %v1350_v55 = vadd.f32 %v1346_v54, %v1252_v53  ;;  %v3538_v53 = vld [vmem:[#allocation15 + $0x40] sm:$0xf]  ;;  %v4058_v54 = vld [vmem:[#allocation15 + $0x44] sm:$0xf0] }
 0x2c4   : > { %vm1351_vm4 = vcmp.ge.f32.partialorder %v1350_v55, 0.0  ;;  %v1352_v56 = vmul.f32 0.2, %v1350_v55 }
 0x2c6   : > { %v1353_v57 = vsel %vm1351_vm4, %v1350_v55, %v1352_v56  ;;  %v4300_v55 = vld [vmem:[%s5043_s13] ss:$0 sm:$0xff] }
 0x2c7   : > { %v1354_v58 = vpack.c.bf16 %v1353_v57, %v1353_v57  ;;  %v3603_v57 = vld [vmem:[#allocation15 + $0xc0] sm:$0xf] }
 0x2c9   : > { %v1348_v61 = vpop.f32.mrf.mxu1  ;;  %v1363_v62 = vsel %vm1361_vm5, %v1354_v58, 0  ;;  %v4074_v58 = vld [vmem:[#allocation15 + $0xc4] sm:$0xf0] }
 0x2ca   : > { %1372 = vmatpush.bf16.msra.mxu3 %v1363_v62  ;;  %1472 = vmatpush.bf16.msra.mxu2 %v1363_v62  ;;  %v3530_v61 = vld [vmem:[#allocation15 + $0x30] sm:$0xf] }
 0x2cb   : > { %1570 = vmatpush.bf16.msrb.mxu1 %v1363_v62  ;;  %1668 = vmatpush.bf16.msra.mxu0 %v1363_v62  ;;  %v4056_v62 = vld [vmem:[#allocation15 + $0x34] sm:$0xf0] }
 0x2cd   : > { %3371 = vmatmul.msk.bf16.vlgmr.msra.gmra.mxu3 %vm1357_vm6, %v1356_v63  ;;  %3404 = vmatmul.msk.bf16.vlgmr.msra.gmra.mxu2 %vm1357_vm6, %v1461_v0  ;;  %v3595_v0 = vld [vmem:[#allocation15 + $0xb0] sm:$0xf] }
 0x2ce   : > { %1544 = vmatpush.bf16.msrb.mxu3 %v4032_v59  ;;  %1642 = vmatpush.bf16.msrb.mxu2 %v4040_v60  ;;  %v3539_v59 = vor.u32 %v4058_v54, %v3538_v53  ;;  %v3604_v60 = vor.u32 %v4074_v58, %v3603_v57  ;;  %v3532_v53 = vld [vmem:[#allocation15 + $0x38] sm:$0xf0]  ;;  %v1759_v54 = vld [vmem:[#allocation9] sm:$0x3]  ;;  %v3621_v57 = vld [vmem:[#allocation15 + $0xe8] sm:$0xf0] }
 0x2cf   : > { %3437 = vmatmul.msk.bf16.vlgmr.msrb.gmra.mxu1 %vm1357_vm6, %v1559_v1  ;;  %v4072_v1 = vld [vmem:[#allocation15 + $0xb4] sm:$0xf0] }
 0x2d0   : > { %1740 = vmatpush.bf16.msra.mxu1 %v4048_v16 }
 0x2d2   : > { %1545 = vmatpush.bf16.msrb.mxu3 %v4031_v2  ;;  %1643 = vmatpush.bf16.msrb.mxu2 %v4039_v3 }
 0x2d4   : > { %1741 = vmatpush.bf16.msra.mxu1 %v4047_v17  ;;  %v4070_v17 = vld [vmem:[#allocation15 + $0xa4] sm:$0xf0] }
 0x2d6   : > { %1546 = vmatpush.bf16.msrb.mxu3 %v4030_v4  ;;  %1644 = vmatpush.bf16.msrb.mxu2 %v4038_v5  ;;  %v3531_v4 = vor.u32 %v4056_v62, %v3530_v61  ;;  %v4075_v62 = vld [vmem:[#allocation15 + $0xd4] sm:$0xf] }
 0x2d8   : > { %1742 = vmatpush.bf16.msra.mxu1 %v4046_v18 }
 0x2da   : > { %1547 = vmatpush.bf16.msrb.mxu3 %v4029_v6  ;;  %1645 = vmatpush.bf16.msrb.mxu2 %v4037_v7  ;;  %v3596_v6 = vor.u32 %v4072_v1, %v3595_v0  ;;  %v4051_v1 = vld [vmem:[#allocation15 + $0x14] sm:$0xf] }
 0x2dc   : > { %1743 = vmatpush.bf16.msra.mxu1 %v4045_v29  ;;  %v4066_v29 = vld [vmem:[#allocation15 + $0x84] sm:$0xf0] }
 0x2de   : > { %1548 = vmatpush.bf16.msrb.mxu3 %v4028_v8  ;;  %1646 = vmatpush.bf16.msrb.mxu2 %v4036_v9 }
 0x2e0   : > { %1744 = vmatpush.bf16.msra.mxu1 %v4044_v30 }
 0x2e2   : > { %1549 = vmatpush.bf16.msrb.mxu3 %v4027_v10  ;;  %1647 = vmatpush.bf16.msrb.mxu2 %v4035_v11 }
 0x2e4   : > { %1745 = vmatpush.bf16.msra.mxu1 %v4043_v31  ;;  %v4063_v31 = vld [vmem:[#allocation15 + $0x74] sm:$0xf] }
 0x2e6   : > { %1550 = vmatpush.bf16.msrb.mxu3 %v4026_v12  ;;  %1648 = vmatpush.bf16.msrb.mxu2 %v4034_v13  ;;  %v3522_v13 = vld [vmem:[#allocation15 + $0x20] sm:$0xf] }
 0x2e8   : > { %1746 = vmatpush.bf16.msra.mxu1 %v4042_v32  ;;  %v3564_v32 = vld [vmem:[#allocation15 + $0x78] sm:$0xf0] }
 0x2e9   : > { %v3567_v34 = vor.u32 %v4063_v31, %v3564_v32  ;;  %v3684_v31 = vld [vmem:[#allocation15 + $0x160] sm:$0xf]  ;;  %v4094_v32 = vld [vmem:[#allocation15 + $0x164] sm:$0xf0] }
 0x2ea   : > { %1551 = vmatpush.bf16.msrb.mxu3 %v4025_v14  ;;  %1649 = vmatpush.bf16.msrb.mxu2 %v4033_v15  ;;  %v4054_v14 = vld [vmem:[#allocation15 + $0x24] sm:$0xf0]  ;;  %v3587_v15 = vld [vmem:[#allocation15 + $0xa0] sm:$0xf] }
 0x2eb   : > { %v3523_v16 = vor.u32 %v4054_v14, %v3522_v13  ;;  %v3588_v18 = vor.u32 %v4070_v17, %v3587_v15  ;;  %v3597_v13 = vld [vmem:[#allocation15 + $0xb8] sm:$0xf0]  ;;  %v4069_v15 = vld [vmem:[#allocation15 + $0xa4] sm:$0xf] }
 0x2ec   : > { %1747 = vmatpush.bf16.msra.mxu1 %v4041_v33  ;;  %v4061_v33 = vld [vmem:[#allocation15 + $0x64] sm:$0xf] }
 0x2ed   : > { %v3559_v36 = vor.u32 %v4061_v33, %v3556_v35  ;;  %v3686_v35 = vld [vmem:[#allocation15 + $0x168] sm:$0xf0] }
 0x2ee   : > { %1891 = vmatpush.bf16.msra.mxu2 %v3567_v34  ;;  %v4093_v34 = vld [vmem:[#allocation15 + $0x164] sm:$0xf] }
 0x2f0   : > { %2027 = vmatpush.bf16.msrb.mxu1 %v3628_v41 }
 0x2f2   : > { %1892 = vmatpush.bf16.msra.mxu2 %v3559_v36  ;;  %v3685_v36 = vor.u32 %v4094_v32, %v3684_v31  ;;  %v3638_v32 = vld [vmem:[#allocation15 + $0x108] sm:$0xf0] }
 0x2f4   : > { %2028 = vmatpush.bf16.msrb.mxu1 %v3620_v45 }
 0x2f6   : > { %1893 = vmatpush.bf16.msra.mxu2 %v3551_v42  ;;  %v3678_v42 = vld [vmem:[#allocation15 + $0x158] sm:$0xf0] }
 0x2f8   : > { %2029 = vmatpush.bf16.msrb.mxu1 %v3612_v52  ;;  %v4055_v52 = vld [vmem:[#allocation15 + $0x34] sm:$0xf] }
 0x2f9   : > { %v3535_v58 = vor.u32 %v4055_v52, %v3532_v53  ;;  %v4089_v52 = vld [vmem:[#allocation15 + $0x144] sm:$0xf] }
 0x2fc   : > { %2030 = vmatpush.bf16.msrb.mxu1 %v3604_v60  ;;  %v3524_v60 = vld [vmem:[#allocation15 + $0x28] sm:$0xf0] }
 0x300   : > { %2031 = vmatpush.bf16.msrb.mxu1 %v3596_v6  ;;  %v4049_v6 = vld [vmem:[#allocation15 + $0x4] sm:$0xf] }
 0x304   : > { %2032 = vmatpush.bf16.msrb.mxu1 %v3588_v18  ;;  %v4067_v18 = vld [vmem:[#allocation15 + $0x94] sm:$0xf] }
 0x34c   : > { %v1572_v19 = vpop.f32.mrf.mxu1 }
 0x34d   : > { %v1576_v20 = vpack.c.bf16 %v1572_v19, %v1572_v19  ;;  %v3514_v19 = vld [vmem:[#allocation15 + $0x10] sm:$0xf] }
 0x34f   : > { %1650 = vmatmul.bf16.vlgmr.msrb.gmra.mxu2 %v1576_v20  ;;  %v4052_v20 = vld [vmem:[#allocation15 + $0x14] sm:$0xf0] }
 0x350   : > { %v1374_v21 = vpop.f32.mrf.mxu3  ;;  %v1474_v22 = vpop.f32.mrf.mxu2 }
 0x351   : > { %v1378_v23 = vpack.c.bf16 %v1374_v21, %v1374_v21  ;;  %v1478_v24 = vpack.c.bf16 %v1474_v22, %v1474_v22  ;;  %v3579_v21 = vld [vmem:[#allocation15 + $0x90] sm:$0xf]  ;;  %v3515_v22 = vor.u32 %v4052_v20, %v3514_v19  ;;  %v3581_v19 = vld [vmem:[#allocation15 + $0x98] sm:$0xf0] }
 0x352   : > { %v3584_v20 = vor.u32 %v4067_v18, %v3581_v19  ;;  %v4083_v18 = vld [vmem:[#allocation15 + $0x114] sm:$0xf] }
 0x353   : > { %1451 = vmatmul.bf16.vlgmr.msrb.gmra.mxu0 %v1378_v23  ;;  %1552 = vmatmul.bf16.vlgmr.msrb.gmra.mxu3 %v1478_v24  ;;  %v4068_v23 = vld [vmem:[#allocation15 + $0x94] sm:$0xf0] }
 0x354   : > { %v1574_v25 = vpop.f32.mrf.mxu1  ;;  %1878 = vmatpush.bf16.msrb.mxu0 %v3563_v37  ;;  %v3580_v24 = vor.u32 %v4068_v23, %v3579_v21  ;;  %v4065_v21 = vld [vmem:[#allocation15 + $0x84] sm:$0xf] }
 0x355   : > { %v3506_v25 = vld [vmem:[#allocation15] sm:$0xf] }
 0x356   : > { %2033 = vmatpush.bf16.msrb.mxu1 %v3580_v24 }
 0x358   : > { %v1376_v26 = vpop.f32.mrf.mxu3  ;;  %v1476_v27 = vpop.f32.mrf.mxu2  ;;  %1879 = vmatpush.bf16.msrb.mxu0 %v3555_v44  ;;  %v3540_v44 = vld [vmem:[#allocation15 + $0x48] sm:$0xf0] }
 0x359   : > { %v4050_v26 = vld [vmem:[#allocation15 + $0x4] sm:$0xf0]  ;;  %v3571_v27 = vld [vmem:[#allocation15 + $0x80] sm:$0xf]  ;;  %v3543_v49 = vor.u32 %v4057_v43, %v3540_v44  ;;  %v3677_v43 = vor.u32 %v4092_v39, %v3676_v38  ;;  %v3735_v38 = vld [vmem:[#allocation15 + $0x1c8] sm:$0xf0] }
 0x35a   : > { %v3572_v30 = vor.u32 %v4066_v29, %v3571_v27  ;;  %v4096_v27 = vld [vmem:[#allocation15 + $0x174] sm:$0xf0] }
 0x35b   : > { %1894 = vmatpush.bf16.msra.mxu2 %v3543_v49  ;;  %v2200_v49 = vld [vmem:[#allocation9 + $0x6] sm:$0x3] }
 0x35c   : > { %1880 = vmatpush.bf16.msrb.mxu0 %v3547_v50  ;;  %2034 = vmatpush.bf16.msrb.mxu1 %v3572_v30  ;;  %v3694_v30 = vld [vmem:[#allocation15 + $0x178] sm:$0xf0] }
 0x35f   : > { %1895 = vmatpush.bf16.msra.mxu2 %v3535_v58  ;;  %v4087_v58 = vld [vmem:[#allocation15 + $0x134] sm:$0xf] }
 0x360   : > { %1881 = vmatpush.bf16.msrb.mxu0 %v3539_v59  ;;  %v4053_v59 = vld [vmem:[#allocation15 + $0x24] sm:$0xf] }
 0x361   : > { %v3527_v0 = vor.u32 %v4053_v59, %v3524_v60  ;;  %v3662_v60 = vld [vmem:[#allocation15 + $0x138] sm:$0xf0] }
 0x363   : > { %3470 = vmatmul.msk.bf16.vlgmr.msra.gmra.mxu0 %vm1357_vm6, %v1657_v28  ;;  %v3507_v28 = vor.u32 %v4050_v26, %v3506_v25  ;;  %1896 = vmatpush.bf16.msra.mxu2 %v3527_v0  ;;  %v3692_v26 = vld [vmem:[#allocation15 + $0x170] sm:$0xf] }
 0x364   : > { %1882 = vmatpush.bf16.msrb.mxu0 %v3531_v4  ;;  %v3693_v29 = vor.u32 %v4096_v27, %v3692_v26  ;;  %v3743_v26 = vld [vmem:[#allocation15 + $0x1d8] sm:$0xf0] }
 0x368   : > { %1883 = vmatpush.bf16.msrb.mxu0 %v3523_v16  ;;  %v3589_v16 = vld [vmem:[#allocation15 + $0xa8] sm:$0xf0] }
 0x369   : > { %v3592_v17 = vor.u32 %v4069_v15, %v3589_v16  ;;  %v3644_v16 = vld [vmem:[#allocation15 + $0x110] sm:$0xf] }
 0x36c   : > { %1884 = vmatpush.bf16.msrb.mxu0 %v3515_v22  ;;  %v3573_v22 = vld [vmem:[#allocation15 + $0x88] sm:$0xf0] }
 0x36d   : > { %v3576_v23 = vor.u32 %v4065_v21, %v3573_v22  ;;  %v3741_v21 = vld [vmem:[#allocation15 + $0x1d0] sm:$0xf]  ;;  %v4108_v22 = vld [vmem:[#allocation15 + $0x1d4] sm:$0xf0] }
 0x370   : > { %1885 = vmatpush.bf16.msrb.mxu0 %v3507_v28  ;;  %v4095_v28 = vld [vmem:[#allocation15 + $0x174] sm:$0xf] }
 0x371   : > { %v3697_v33 = vor.u32 %v4095_v28, %v3694_v30  ;;  %v3636_v28 = vld [vmem:[#allocation15 + $0x100] sm:$0xf]  ;;  %v4081_v30 = vld [vmem:[#allocation15 + $0x104] sm:$0xf] }
 0x3d0   : > { %v1452_v51 = vpop.f32.mrf.mxu0 }
 0x3d1   : > { %v1459_v63 = vadd.f32 %v4300_v55, %v1452_v51  ;;  %v3632_v55 = vor.u32 %v4079_v47, %v3629_v48  ;;  %v2056_v47 = vld [vmem:[#allocation9 + $0x4] sm:$0x3] }
 0x3d2   : > { %v1651_v56 = vpop.f32.mrf.mxu2 }
 0x3d6   : > { %v1553_v2 = vpop.f32.mrf.mxu3 }
 0x3d7   : > { %v1557_v3 = vadd.f32 %v1553_v2, %v1459_v63  ;;  %v3613_v63 = vld [vmem:[#allocation15 + $0xd8] sm:$0xf0] }
 0x3d8   : > { %v1454_v5 = vpop.f32.mrf.mxu0  ;;  %v3516_v2 = vld [vmem:[#allocation15 + $0x18] sm:$0xf0] }
 0x3d9   : > { %v1655_v7 = vadd.f32 %v1651_v56, %v1557_v3  ;;  %v4077_v56 = vld [vmem:[#allocation15 + $0xe4] sm:$0xf]  ;;  %v3616_v3 = vor.u32 %v4075_v62, %v3613_v63  ;;  %v3519_v4 = vor.u32 %v4051_v1, %v3516_v2  ;;  %v1912_v5 = vld [vmem:[#allocation9 + $0x2] sm:$0x3]  ;;  %v3665_v63 = vor.u32 %v4087_v58, %v3662_v60  ;;  %v4111_v1 = vld [vmem:[#allocation15 + $0x1f4] sm:$0xf] }
 0x3da   : > { %v1653_v8 = vpop.f32.mrf.mxu2  ;;  %v3624_v61 = vor.u32 %v4077_v56, %v3621_v57  ;;  %v3660_v56 = vld [vmem:[#allocation15 + $0x130] sm:$0xf]  ;;  %v4088_v57 = vld [vmem:[#allocation15 + $0x134] sm:$0xf0]  ;;  %v3759_v2 = vld [vmem:[#allocation15 + $0x1f8] sm:$0xf0] }
 0x3db   : > { %1897 = vmatpush.bf16.msra.mxu2 %v3519_v4  ;;  %v4073_v8 = vld [vmem:[#allocation15 + $0xc4] sm:$0xf]  ;;  %v3661_v59 = vor.u32 %v4088_v57, %v3660_v56  ;;  %v4112_v62 = vld [vmem:[#allocation15 + $0x1f4] sm:$0xf0]  ;;  %v3652_v4 = vld [vmem:[#allocation15 + $0x120] sm:$0xf] }
 0x3dc   : > { %v3701_v58 = vld [vmem:[#allocation15 + $0x180] sm:$0xf]  ;;  %v4097_v60 = vld [vmem:[#allocation15 + $0x184] sm:$0xf] }
 0x3de   : > { %v1555_v9 = vpop.f32.mrf.mxu3 }
 0x3e0   : > { %v1670_v10 = vpop.f32.mrf.mxu0 }
 0x3e1   : > { %v1674_v11 = vpack.c.bf16 %v1670_v10, %v1670_v10  ;;  %v3605_v10 = vld [vmem:[#allocation15 + $0xc8] sm:$0xf0] }
 0x3e3   : > { %1748 = vmatmul.bf16.vlgmr.msra.gmra.mxu1 %v1674_v11  ;;  %v3608_v11 = vor.u32 %v4073_v8, %v3605_v10  ;;  %v3654_v8 = vld [vmem:[#allocation15 + $0x128] sm:$0xf0] }
 0x3e8   : > { %v1672_v12 = vpop.f32.mrf.mxu0 }
 0x3e9   : > { %v4071_v12 = vld [vmem:[#allocation15 + $0xb4] sm:$0xf] }
 0x3ea   : > { %v3600_v14 = vor.u32 %v4071_v12, %v3597_v13  ;;  %v4109_v12 = vld [vmem:[#allocation15 + $0x1e4] sm:$0xf]  ;;  %v3751_v13 = vld [vmem:[#allocation15 + $0x1e8] sm:$0xf0] }
 0x3eb   : > { %v3754_v15 = vor.u32 %v4109_v12, %v3751_v13 }
 0x460   : > { %v1749_v37 = vpop.f32.mrf.mxu1 }
 0x461   : > { %v1753_v40 = vadd.f32 %v1749_v37, %v1655_v7  ;;  %v3508_v7 = vld [vmem:[#allocation15 + $0x8] sm:$0xf0]  ;;  %v3689_v37 = vor.u32 %v4093_v34, %v3686_v35  ;;  %v4106_v34 = vld [vmem:[#allocation15 + $0x1c4] sm:$0xf0]  ;;  %v3641_v35 = vor.u32 %v4081_v30, %v3638_v32 }
 0x462   : > { %v3511_v9 = vor.u32 %v4049_v6, %v3508_v7  ;;  %v4085_v7 = vld [vmem:[#allocation15 + $0x124] sm:$0xf] }
 0x463   : > { %vm1754_vm7 = vcmp.ge.f32.partialorder %v1753_v40, 0.0  ;;  %v1755_v41 = vmul.f32 0.2, %v1753_v40  ;;  %v3657_v10 = vor.u32 %v4085_v7, %v3654_v8 }
 0x464   : > { %1898 = vmatpush.bf16.msra.mxu2 %v3511_v9  ;;  %v3749_v9 = vld [vmem:[#allocation15 + $0x1e0] sm:$0xf] }
 0x465   : > { %v1756_v45 = vsel %vm1754_vm7, %v1753_v40, %v1755_v41  ;;  %v4091_v41 = vld [vmem:[#allocation15 + $0x154] sm:$0xf] }
 0x466   : > { %v1757_v46 = vpack.c.bf16 %v1756_v45, %v1756_v45  ;;  %v3681_v44 = vor.u32 %v4091_v41, %v3678_v42  ;;  %v4104_v41 = vld [vmem:[#allocation15 + $0x1b4] sm:$0xf0]  ;;  %v4103_v42 = vld [vmem:[#allocation15 + $0x1b4] sm:$0xf] }
 0x468   : > { %v1751_v50 = vpop.f32.mrf.mxu1  ;;  %v1766_v51 = vsel %vm1764_vm8, %v1757_v46, 0  ;;  %2171 = vmatpush.bf16.msrb.mxu2 %v3693_v29  ;;  %v4082_v29 = vld [vmem:[#allocation15 + $0x104] sm:$0xf0] }
 0x469   : > { %1775 = vmatpush.bf16.msra.mxu3 %v1766_v51  ;;  %2067 = vmatpush.bf16.msra.mxu0 %v1766_v51  ;;  %v3668_v50 = vld [vmem:[#allocation15 + $0x140] sm:$0xf]  ;;  %v3637_v31 = vor.u32 %v4082_v29, %v3636_v28  ;;  %v4673_v28 = vmov 65535  }
 0x46a   : > { %2211 = vmatpush.bf16.msra.mxu1 %v1766_v51  ;;  %v2358_v29 = vsel %vm2357_vm10, 4294967295, %v4673_v28  ;;  %v4140_v28 = vld [vmem:[#allocation16 + $0xd8] sm:$0xff] }
 0x46c   : > { %3503 = vmatmul.msk.bf16.vlgmr.msra.gmra.mxu3 %vm1760_vm9, %v1759_v54  ;;  %2172 = vmatpush.bf16.msrb.mxu2 %v3685_v36  ;;  %v3670_v54 = vld [vmem:[#allocation15 + $0x148] sm:$0xf0] }
 0x46d   : > { %1923 = vmatpush.bf16.msrb.mxu3 %v1766_v51  ;;  %v4090_v51 = vld [vmem:[#allocation15 + $0x144] sm:$0xf0] }
 0x46e   : > { %v3669_v53 = vor.u32 %v4090_v51, %v3668_v50  ;;  %v3719_v50 = vld [vmem:[#allocation15 + $0x1a8] sm:$0xf0] }
 0x470   : > { %2173 = vmatpush.bf16.msrb.mxu2 %v3677_v43 }
 0x471   : > { %2040 = vmatpush.bf16.msra.mxu3 %v3632_v55  ;;  %v3673_v55 = vor.u32 %v4089_v52, %v3670_v54  ;;  %v3709_v52 = vld [vmem:[#allocation15 + $0x190] sm:$0xf]  ;;  %v4099_v54 = vld [vmem:[#allocation15 + $0x194] sm:$0xf] }
 0x474   : > { %2174 = vmatpush.bf16.msrb.mxu2 %v3669_v53  ;;  %v4100_v53 = vld [vmem:[#allocation15 + $0x194] sm:$0xf0] }
 0x475   : > { %2041 = vmatpush.bf16.msra.mxu3 %v3624_v61  ;;  %v3757_v61 = vld [vmem:[#allocation15 + $0x1f0] sm:$0xf]  ;;  %v3710_v56 = vor.u32 %v4100_v53, %v3709_v52  ;;  %v4117_v52 = vld [vmem:[#allocation16 + $0x20] sm:$0xff] }
 0x476   : > { %v3758_v0 = vor.u32 %v4112_v62, %v3757_v61  ;;  %v3703_v62 = vld [vmem:[#allocation15 + $0x188] sm:$0xf0]  ;;  %v4121_v53 = vld [vmem:[#allocation16 + $0x40] sm:$0xff] }
 0x478   : > { %2175 = vmatpush.bf16.msrb.mxu2 %v3661_v59  ;;  %v4098_v59 = vld [vmem:[#allocation15 + $0x184] sm:$0xf0] }
 0x479   : > { %2042 = vmatpush.bf16.msra.mxu3 %v3616_v3  ;;  %v3762_v3 = vor.u32 %v4111_v1, %v3759_v2  ;;  %v3702_v61 = vor.u32 %v4098_v59, %v3701_v58  ;;  %v1758_v2 = vld [vmem:[%s5073_s15] sm:$0x3]  ;;  %v4130_v58 = vld [vmem:[#allocation16 + $0x88] sm:$0xff]  ;;  %s690_s15 = scalar_lea.vmem %s5076_s2, %s3182_s0 }
 0x47a   : > { %v1906_v8 = vperm.slane %v1758_v2, 1  ;;  %v4114_v59 = vld [vmem:[#allocation16 + $0x8] sm:$0xff] }
 0x47c   : > { %3568 = vmatmul.msk.bf16.vlgmr.msrb.gmra.mxu3 %vm1760_vm9, %v1912_v5  ;;  %v4086_v5 = vld [vmem:[#allocation15 + $0x124] sm:$0xf0] }
 0x47d   : > { %2043 = vmatpush.bf16.msra.mxu3 %v3608_v11  ;;  %v3653_v6 = vor.u32 %v4086_v5, %v3652_v4  ;;  %v4110_v11 = vld [vmem:[#allocation15 + $0x1e4] sm:$0xf0]  ;;  %v1905_v4 = vperm.slane %v1758_v2, 0  ;;  %v4136_v2 = vld [vmem:[#allocation16 + $0xb8] sm:$0xff] }
 0x47f   : > { %2176 = vmatpush.bf16.msrb.mxu2 %v3653_v6 }
 0x481   : > { %2044 = vmatpush.bf16.msra.mxu3 %v3600_v14  ;;  %v3750_v14 = vor.u32 %v4110_v11, %v3749_v9 }
 0x485   : > { %2045 = vmatpush.bf16.msra.mxu3 %v3592_v17  ;;  %v4084_v17 = vld [vmem:[#allocation15 + $0x114] sm:$0xf0] }
 0x486   : > { %v3645_v19 = vor.u32 %v4084_v17, %v3644_v16 }
 0x488   : > { %2177 = vmatpush.bf16.msrb.mxu2 %v3645_v19 }
 0x489   : > { %2046 = vmatpush.bf16.msra.mxu3 %v3584_v20  ;;  %v3646_v20 = vld [vmem:[#allocation15 + $0x118] sm:$0xf0] }
 0x48c   : > { %2178 = vmatpush.bf16.msrb.mxu2 %v3637_v31  ;;  %v2359_v31 = vsel %vm1764_vm8, %v2358_v29, 0  ;;  %v4156_v29 = vld [vmem:[#allocation16 + $0x158] sm:$0xff] }
 0x48d   : > { %2047 = vmatpush.bf16.msra.mxu3 %v3576_v23  ;;  %v3649_v23 = vor.u32 %v4083_v18, %v3646_v20 }
 0x491   : > { %2315 = vmatpush.bf16.msrb.mxu3 %v3758_v0  ;;  %v3706_v0 = vor.u32 %v4097_v60, %v3703_v62  ;;  %v4129_v60 = vld [vmem:[#allocation16 + $0x80] sm:$0xff]  ;;  %v4128_v62 = vld [vmem:[#allocation16 + $0x78] sm:$0xff] }
 0x495   : > { %2316 = vmatpush.bf16.msrb.mxu3 %v3750_v14 }
 0x4ef   : > { %v1777_v24 = vpop.f32.mrf.mxu3 }
 0x4f0   : > { %v1781_v25 = vpack.c.bf16 %v1777_v24, %v1777_v24  ;;  %v3742_v24 = vor.u32 %v4108_v22, %v3741_v21 }
 0x4f2   : > { %1886 = vmatmul.bf16.vlgmr.msrb.gmra.mxu0 %v1781_v25  ;;  %1899 = vmatmul.bf16.vlgmr.msra.gmra.mxu2 %v1781_v25  ;;  %v4107_v25 = vld [vmem:[#allocation15 + $0x1d4] sm:$0xf] }
 0x4f3   : > { %2184 = vmatpush.bf16.msrb.mxu0 %v3697_v33  ;;  %v3746_v27 = vor.u32 %v4107_v25, %v3743_v26  ;;  %2317 = vmatpush.bf16.msrb.mxu3 %v3742_v24  ;;  %v3733_v33 = vld [vmem:[#allocation15 + $0x1c0] sm:$0xf] }
 0x4f4   : > { %v3734_v36 = vor.u32 %v4106_v34, %v3733_v33 }
 0x4f7   : > { %v1779_v40 = vpop.f32.mrf.mxu3  ;;  %2185 = vmatpush.bf16.msrb.mxu0 %v3689_v37  ;;  %v4105_v37 = vld [vmem:[#allocation15 + $0x1c4] sm:$0xf]  ;;  %2318 = vmatpush.bf16.msrb.mxu3 %v3734_v36 }
 0x4f8   : > { %v3738_v39 = vor.u32 %v4105_v37, %v3735_v38  ;;  %v3725_v40 = vld [vmem:[#allocation15 + $0x1b0] sm:$0xf] }
 0x4f9   : > { %v3726_v43 = vor.u32 %v4104_v41, %v3725_v40  ;;  %v2352_v40 = vld [vmem:[%s5074_s27] sm:$0x1] }
 0x4fb   : > { %2186 = vmatpush.bf16.msrb.mxu0 %v3681_v44  ;;  %v3727_v44 = vld [vmem:[#allocation15 + $0x1b8] sm:$0xf0]  ;;  %2319 = vmatpush.bf16.msrb.mxu3 %v3726_v43  ;;  %v3814_v43 = vld [vmem:[%s5074_s27 + $0x1] sm:$0x1] }
 0x4ff   : > { %v1925_v45 = vpop.f32.mrf.mxu3  ;;  %2187 = vmatpush.bf16.msrb.mxu0 %v3673_v55  ;;  %v3711_v55 = vld [vmem:[#allocation15 + $0x198] sm:$0xf0] }
 0x500   : > { %v1929_v46 = vpack.c.bf16 %v1925_v45, %v1925_v45  ;;  %v3730_v45 = vor.u32 %v4103_v42, %v3727_v44  ;;  %v3714_v57 = vor.u32 %v4099_v54, %v3711_v55  ;;  %v4120_v44 = vld [vmem:[#allocation16 + $0x38] sm:$0xff] }
 0x501   : > { %v4132_v54 = vld [vmem:[#allocation16 + $0x98] sm:$0xff] }
 0x502   : > { %2035 = vmatmul.bf16.vlgmr.msrb.gmra.mxu1 %v1929_v46  ;;  %2048 = vmatmul.bf16.vlgmr.msra.gmra.mxu3 %v1929_v46  ;;  %v3717_v46 = vld [vmem:[#allocation15 + $0x1a0] sm:$0xf]  ;;  %v4116_v55 = vld [vmem:[#allocation16 + $0x18] sm:$0xff] }
 0x503   : > { %3633 = vmatmul.msk.bf16.vlgmr.msra.gmra.mxu0 %vm1760_vm9, %v2056_v47  ;;  %2328 = vmatpush.bf16.msrb.mxu1 %v3762_v3  ;;  %v4102_v47 = vld [vmem:[#allocation15 + $0x1a4] sm:$0xf0] }
 0x504   : > { %2188 = vmatpush.bf16.msrb.mxu0 %v3665_v63 }
 0x507   : > { %v1927_v48 = vpop.f32.mrf.mxu3  ;;  %2329 = vmatpush.bf16.msrb.mxu1 %v3754_v15 }
 0x508   : > { %2189 = vmatpush.bf16.msrb.mxu0 %v3657_v10  ;;  %v4101_v48 = vld [vmem:[#allocation15 + $0x1a4] sm:$0xf] }
 0x509   : > { %v3722_v51 = vor.u32 %v4101_v48, %v3719_v50  ;;  %v4119_v48 = vld [vmem:[#allocation16 + $0x30] sm:$0xff]  ;;  %v4118_v50 = vld [vmem:[#allocation16 + $0x28] sm:$0xff] }
 0x50b   : > { %2330 = vmatpush.bf16.msrb.mxu1 %v3746_v27 }
 0x50c   : > { %2190 = vmatpush.bf16.msrb.mxu0 %v3649_v23 }
 0x50f   : > { %2331 = vmatpush.bf16.msrb.mxu1 %v3738_v39 }
 0x510   : > { %2191 = vmatpush.bf16.msrb.mxu0 %v3641_v35 }
 0x512   : > { %3698 = vmatmul.msk.bf16.vlgmr.msra.gmra.mxu1 %vm1760_vm9, %v2200_v49  ;;  %v3718_v49 = vor.u32 %v4102_v47, %v3717_v46  ;;  %v4124_v47 = vld [vmem:[#allocation16 + $0x58] sm:$0xff] }
 0x513   : > { %2332 = vmatpush.bf16.msrb.mxu1 %v3730_v45 }
 0x514   : > { %2320 = vmatpush.bf16.msrb.mxu3 %v3718_v49  ;;  %v4123_v49 = vld [vmem:[#allocation16 + $0x50] sm:$0xff] }
 0x517   : > { %2333 = vmatpush.bf16.msrb.mxu1 %v3722_v51  ;;  %v4122_v51 = vld [vmem:[#allocation16 + $0x48] sm:$0xff] }
 0x518   : > { %2321 = vmatpush.bf16.msrb.mxu3 %v3710_v56  ;;  %v4131_v56 = vld [vmem:[#allocation16 + $0x90] sm:$0xff] }
 0x51b   : > { %2334 = vmatpush.bf16.msrb.mxu1 %v3714_v57  ;;  %v4115_v57 = vld [vmem:[#allocation16 + $0x10] sm:$0xff] }
 0x51c   : > { %2322 = vmatpush.bf16.msrb.mxu3 %v3702_v61  ;;  %v4113_v61 = vld [vmem:[#allocation16] sm:$0xff] }
 0x51f   : > { %2335 = vmatpush.bf16.msrb.mxu1 %v3706_v0  ;;  %v4126_v0 = vld [vmem:[#allocation16 + $0x68] sm:$0xff] }
 0x520   : > { %2511 = vmatpush.bf16.msra.mxu3 %v4124_v47  ;;  %v4151_v47 = vld [vmem:[#allocation16 + $0x130] sm:$0xff] }
 0x524   : > { %2512 = vmatpush.bf16.msra.mxu3 %v4123_v49 }
 0x528   : > { %2513 = vmatpush.bf16.msra.mxu3 %v4122_v51 }
 0x52c   : > { %2514 = vmatpush.bf16.msra.mxu3 %v4121_v53  ;;  %v4301_v53 = vld [vmem:[%s5075_s16] ss:$0 sm:$0xff] }
 0x56f   : > { %v1887_v63 = vpop.f32.mrf.mxu0 }
 0x570   : > { %v1909_v6 = vadd.f32 %v1905_v4, %v1887_v63  ;;  %v4127_v63 = vld [vmem:[#allocation16 + $0x70] sm:$0xff]  ;;  %v4134_v4 = vld [vmem:[#allocation16 + $0xa8] sm:$0xff] }
 0x575   : > { %v1900_v1 = vpop.f32.mrf.mxu2 }
 0x576   : > { %v1910_v12 = vadd.f32 %v1906_v8, %v1900_v1  ;;  %v4125_v1 = vld [vmem:[#allocation16 + $0x60] sm:$0xff] }
 0x577   : > { %v1889_v3 = vpop.f32.mrf.mxu0 }
 0x578   : > { %v4135_v3 = vld [vmem:[#allocation16 + $0xb0] sm:$0xff] }
 0x57d   : > { %v1902_v5 = vpop.f32.mrf.mxu2 }
 0x57e   : > { %v4133_v5 = vld [vmem:[#allocation16 + $0xa0] sm:$0xff] }
 0x57f   : > { %v2036_v7 = vpop.f32.mrf.mxu1 }
 0x580   : > { %v2053_v9 = vadd.f32 %v2036_v7, %v1909_v6  ;;  %v2069_v10 = vpop.f32.mrf.mxu0  ;;  %v3866_v6 = vld [vmem:[%s5074_s27 + $0x2] sm:$0x1] }
 0x581   : > { %v2073_v11 = vpack.c.bf16 %v2069_v10, %v2069_v10 }
 0x583   : > { %2179 = vmatmul.bf16.vlgmr.msrb.gmra.mxu2 %v2073_v11  ;;  %2192 = vmatmul.bf16.vlgmr.msrb.gmra.mxu0 %v2073_v11 }
 0x585   : > { %v2049_v13 = vpop.f32.mrf.mxu3 }
 0x586   : > { %v2054_v14 = vadd.f32 %v2049_v13, %v1910_v12 }
 0x587   : > { %v2038_v15 = vpop.f32.mrf.mxu1 }
 0x588   : > { %v2071_v16 = vpop.f32.mrf.mxu0  ;;  %v4144_v15 = vld [vmem:[#allocation16 + $0xf8] sm:$0xff] }
 0x589   : > { %v4148_v16 = vld [vmem:[#allocation16 + $0x118] sm:$0xff] }
 0x58d   : > { %v2051_v17 = vpop.f32.mrf.mxu3 }
 0x58f   : > { %v2213_v18 = vpop.f32.mrf.mxu1 }
 0x590   : > { %v2217_v19 = vpack.c.bf16 %v2213_v18, %v2213_v18 }
 0x592   : > { %2323 = vmatmul.bf16.vlgmr.msrb.gmra.mxu3 %v2217_v19  ;;  %2336 = vmatmul.bf16.vlgmr.msrb.gmra.mxu1 %v2217_v19  ;;  %v4143_v19 = vld [vmem:[#allocation16 + $0xf0] sm:$0xff] }
 0x593   : > { %2657 = vmatpush.bf16.msrb.mxu3 %v4132_v54 }
 0x597   : > { %v2215_v20 = vpop.f32.mrf.mxu1  ;;  %2658 = vmatpush.bf16.msrb.mxu3 %v4131_v56 }
 0x59b   : > { %2659 = vmatpush.bf16.msrb.mxu3 %v4130_v58 }
 0x59f   : > { %2660 = vmatpush.bf16.msrb.mxu3 %v4129_v60 }
 0x5a3   : > { %2661 = vmatpush.bf16.msrb.mxu3 %v4128_v62 }
 0x5a7   : > { %2662 = vmatpush.bf16.msrb.mxu3 %v4127_v63 }
 0x5ab   : > { %2663 = vmatpush.bf16.msrb.mxu3 %v4126_v0 }
 0x5af   : > { %2664 = vmatpush.bf16.msrb.mxu3 %v4125_v1 }
 0x600   : > { %v2193_v21 = vpop.f32.mrf.mxu0 }
 0x601   : > { %v2198_v24 = vadd.f32 %v2193_v21, %v2054_v14 }
 0x606   : > { %v2180_v22 = vpop.f32.mrf.mxu2 }
 0x607   : > { %v2197_v32 = vadd.f32 %v2180_v22, %v2053_v9  ;;  %v3918_v22 = vld [vmem:[%s5074_s27 + $0x3] sm:$0x1] }
 0x608   : > { %v2195_v23 = vpop.f32.mrf.mxu0 }
 0x609   : > { %v4147_v23 = vld [vmem:[#allocation16 + $0x110] sm:$0xff] }
 0x60e   : > { %v2182_v25 = vpop.f32.mrf.mxu2 }
 0x60f   : > { %v2337_v26 = vpop.f32.mrf.mxu1  ;;  %v4146_v25 = vld [vmem:[#allocation16 + $0x108] sm:$0xff] }
 0x610   : > { %v2342_v27 = vadd.f32 %v2337_v26, %v2198_v24  ;;  %v4142_v24 = vld [vmem:[#allocation16 + $0xe8] sm:$0xff]  ;;  %v4141_v26 = vld [vmem:[#allocation16 + $0xe0] sm:$0xff] }
 0x612   : > { %vm2344_vm11 = vcmp.ge.f32.partialorder %v2342_v27, 0.0  ;;  %v2346_v30 = vmul.f32 0.2, %v2342_v27 }
 0x614   : > { %v2348_v33 = vsel %vm2344_vm11, %v2342_v27, %v2346_v30  ;;  %v4145_v27 = vld [vmem:[#allocation16 + $0x100] sm:$0xff]  ;;  %v4139_v30 = vld [vmem:[#allocation16 + $0xd0] sm:$0xff] }
 0x615   : > { %v2350_v34 = vpack.c.bf16 %v2348_v33, %v2348_v33  ;;  %v2324_v35 = vpop.f32.mrf.mxu3 }
 0x616   : > { %v2341_v36 = vadd.f32 %v2324_v35, %v2197_v32  ;;  %v4160_v32 = vld [vmem:[#allocation16 + $0x178] sm:$0xff]  ;;  %v4154_v35 = vld [vmem:[#allocation16 + $0x148] sm:$0xff] }
 0x617   : > { %v4973_v37 = vand.u32 %v2359_v31, %v2350_v34  ;;  %v2339_v38 = vpop.f32.mrf.mxu1  ;;  %v4138_v34 = vld [vmem:[#allocation16 + $0xc8] sm:$0xff] }
 0x618   : > { %vm2343_vm12 = vcmp.ge.f32.partialorder %v2341_v36, 0.0  ;;  %v2345_v39 = vmul.f32 0.2, %v2341_v36  ;;  %v4137_v38 = vld [vmem:[#allocation16 + $0xc0] sm:$0xff] }
 0x619   : > { %2386 = vmatpush.bf16.msra.mxu0 %v4973_v37  ;;  %2549 = vmatpush.bf16.msra.mxu1 %v4973_v37 }
 0x61a   : > { %v2347_v41 = vsel %vm2343_vm12, %v2341_v36, %v2345_v39  ;;  %v4159_v36 = vld [vmem:[#allocation16 + $0x170] sm:$0xff]  ;;  %v4153_v39 = vld [vmem:[#allocation16 + $0x140] sm:$0xff] }
 0x61b   : > { %v2349_v42 = vpack.c.bf16 %v2347_v41, %v2347_v41 }
 0x61c   : > { %3764 = vmatmul.msk.bf16.vlgmr.msra.gmra.mxu0 %vm2353_vm13, %v2352_v40  ;;  %3816 = vmatmul.msk.bf16.vlgmr.msra.gmra.mxu1 %vm2353_vm13, %v3814_v43 }
 0x61d   : > { %v4985_v45 = vand.u32 %v2359_v31, %v2349_v42  ;;  %v2326_v46 = vpop.f32.mrf.mxu3  ;;  %v4155_v31 = vld [vmem:[#allocation16 + $0x150] sm:$0xff] }
 0x61f   : > { %2373 = vmatpush.bf16.msra.mxu2 %v4985_v45  ;;  %2536 = vmatpush.bf16.msrb.mxu0 %v4985_v45 }
 0x620   : > { %2696 = vmatpush.bf16.msrb.mxu1 %v4985_v45 }
 0x622   : > { %3763 = vmatmul.msk.bf16.vlgmr.msra.gmra.mxu2 %vm2353_vm13, %v2352_v40  ;;  %v4158_v40 = vld [vmem:[#allocation16 + $0x168] sm:$0xff] }
 0x623   : > { %2494 = vmatpush.bf16.msrb.mxu2 %v4120_v44  ;;  %2674 = vmatpush.bf16.msra.mxu0 %v4136_v2  ;;  %v4157_v44 = vld [vmem:[#allocation16 + $0x160] sm:$0xff] }
 0x624   : > { %2834 = vmatpush.bf16.msra.mxu1 %v4148_v16 }
 0x627   : > { %2495 = vmatpush.bf16.msrb.mxu2 %v4119_v48  ;;  %2675 = vmatpush.bf16.msra.mxu0 %v4135_v3  ;;  %v4150_v48 = vld [vmem:[#allocation16 + $0x128] sm:$0xff] }
 0x628   : > { %2835 = vmatpush.bf16.msra.mxu1 %v4147_v23 }
 0x62b   : > { %2496 = vmatpush.bf16.msrb.mxu2 %v4118_v50  ;;  %2676 = vmatpush.bf16.msra.mxu0 %v4134_v4  ;;  %v4149_v50 = vld [vmem:[#allocation16 + $0x120] sm:$0xff] }
 0x62c   : > { %3815 = vmatmul.msk.bf16.vlgmr.msrb.gmra.mxu0 %vm2353_vm13, %v3814_v43  ;;  %3867 = vmatmul.msk.bf16.vlgmr.msrb.gmra.mxu1 %vm2353_vm13, %v3866_v6  ;;  %v4152_v43 = vld [vmem:[#allocation16 + $0x138] sm:$0xff] }
 0x62d   : > { %2836 = vmatpush.bf16.msra.mxu1 %v4146_v25 }
 0x62f   : > { %2497 = vmatpush.bf16.msrb.mxu2 %v4117_v52  ;;  %2677 = vmatpush.bf16.msra.mxu0 %v4133_v5 }
 0x631   : > { %2837 = vmatpush.bf16.msra.mxu1 %v4145_v27 }
 0x633   : > { %2498 = vmatpush.bf16.msrb.mxu2 %v4116_v55  ;;  %2817 = vmatpush.bf16.msrb.mxu0 %v4144_v15 }
 0x635   : > { %2977 = vmatpush.bf16.msrb.mxu1 %v4156_v29 }
 0x637   : > { %2499 = vmatpush.bf16.msrb.mxu2 %v4115_v57  ;;  %2818 = vmatpush.bf16.msrb.mxu0 %v4143_v19 }
 0x639   : > { %2978 = vmatpush.bf16.msrb.mxu1 %v4155_v31 }
 0x63b   : > { %2500 = vmatpush.bf16.msrb.mxu2 %v4114_v59  ;;  %2819 = vmatpush.bf16.msrb.mxu0 %v4142_v24 }
 0x63d   : > { %2979 = vmatpush.bf16.msrb.mxu1 %v4154_v35 }
 0x63f   : > { %2501 = vmatpush.bf16.msrb.mxu2 %v4113_v61  ;;  %2820 = vmatpush.bf16.msrb.mxu0 %v4141_v26 }
 0x641   : > { %2980 = vmatpush.bf16.msrb.mxu1 %v4153_v39 }
 0x643   : > { %2709 = vmatpush.bf16.msra.mxu2 %v4973_v37  ;;  %2821 = vmatpush.bf16.msrb.mxu0 %v4140_v28 }
 0x645   : > { %2981 = vmatpush.bf16.msrb.mxu1 %v4152_v43 }
 0x647   : > { %2822 = vmatpush.bf16.msrb.mxu0 %v4139_v30 }
 0x649   : > { %2982 = vmatpush.bf16.msrb.mxu1 %v4151_v47 }
 0x64b   : > { %2823 = vmatpush.bf16.msrb.mxu0 %v4138_v34 }
 0x64d   : > { %2983 = vmatpush.bf16.msrb.mxu1 %v4150_v48 }
 0x64f   : > { %2824 = vmatpush.bf16.msrb.mxu0 %v4137_v38 }
 0x651   : > { %2984 = vmatpush.bf16.msrb.mxu1 %v4149_v50 }
 0x699   : > { %v2388_v7 = vpop.f32.mrf.mxu0  ;;  %v2551_v8 = vpop.f32.mrf.mxu1 }
 0x69a   : > { %v2393_v9 = vpack.c.bf16 %v2388_v7, %v2388_v7  ;;  %v2556_v10 = vpack.c.bf16 %v2551_v8, %v2551_v8 }
 0x69c   : > { %3813 = vmatmul.msk.bf16.vlgmr.msra.gmra.mxu3 %vm2490_vm14, %v2393_v9  ;;  %3865 = vmatmul.msk.bf16.vlgmr.msra.gmra.mxu0 %vm2490_vm14, %v2556_v10 }
 0x69d   : > { %2869 = vmatpush.bf16.msra.mxu3 %v4973_v37 }
 0x6a1   : > { %v2390_v11 = vpop.f32.mrf.mxu0  ;;  %v2553_v12 = vpop.f32.mrf.mxu1 }
 0x6a5   : > { %v2375_v13 = vpop.f32.mrf.mxu2 }
 0x6a6   : > { %v2392_v14 = vpack.c.bf16 %v2375_v13, %v2375_v13 }
 0x6a8   : > { %2502 = vmatmul.bf16.vlgmr.msrb.gmra.mxu2 %v2392_v14 }
 0x6a9   : > { %2856 = vmatpush.bf16.msrb.mxu2 %v4985_v45  ;;  %v2538_v17 = vpop.f32.mrf.mxu0  ;;  %v2698_v33 = vpop.f32.mrf.mxu1 }
 0x6aa   : > { %v2555_v18 = vpack.c.bf16 %v2538_v17, %v2538_v17  ;;  %v2715_v41 = vpack.c.bf16 %v2698_v33, %v2698_v33 }
 0x6ac   : > { %2665 = vmatmul.bf16.vlgmr.msrb.gmra.mxu3 %v2555_v18  ;;  %2825 = vmatmul.bf16.vlgmr.msrb.gmra.mxu0 %v2715_v41 }
 0x6ad   : > { %v2377_v20 = vpop.f32.mrf.mxu2 }
 0x6b1   : > { %v2540_v21 = vpop.f32.mrf.mxu0  ;;  %v2700_v42 = vpop.f32.mrf.mxu1 }
 0x6b8   : > { %3868 = vmatmul.msk.bf16.vlgmr.msra.gmra.mxu2 %vm2353_vm13, %v3866_v6 }
 0x6b9   : > { %2994 = vmatpush.bf16.msra.mxu2 %v4160_v32 }
 0x6bc   : > { %3920 = vmatmul.msk.bf16.vlgmr.msra.gmra.mxu3 %vm2353_vm13, %v3918_v22 }
 0x6bd   : > { %2995 = vmatpush.bf16.msra.mxu2 %v4159_v36 }
 0x6c1   : > { %2996 = vmatpush.bf16.msra.mxu2 %v4158_v40 }
 0x6c5   : > { %2997 = vmatpush.bf16.msra.mxu2 %v4157_v44 }
 0x6c8   : > { %3919 = vmatmul.msk.bf16.vlgmr.msrb.gmra.mxu2 %vm2353_vm13, %v3918_v22 }
 0x719   : > { %v2679_v37 = vpop.f32.mrf.mxu0 }
 0x71f   : > { %v2516_v45 = vpop.f32.mrf.mxu3 }
 0x721   : > { %v2681_v46 = vpop.f32.mrf.mxu0 }
 0x727   : > { %v2518_v49 = vpop.f32.mrf.mxu3 }
 0x729   : > { %v2826_v5 = vpop.f32.mrf.mxu0 }
 0x72b   : > { %v2503_v51 = vpop.f32.mrf.mxu2 }
 0x72c   : > { %v2517_v52 = vadd.f32 %v2516_v45, %v2503_v51 }
 0x72e   : > { %v2523_v55 = vadd.f32 %v4301_v53, %v2517_v52 }
 0x72f   : > { %v2666_v54 = vpop.f32.mrf.mxu3 }
 0x730   : > { %v2680_v56 = vadd.f32 %v2679_v37, %v2666_v54 }
 0x731   : > { %v2828_v6 = vpop.f32.mrf.mxu0 }
 0x732   : > { %v2683_v57 = vadd.f32 %v2680_v56, %v2523_v55 }
 0x733   : > { %v2505_v58 = vpop.f32.mrf.mxu2 }
 0x737   : > { %v2668_v59 = vpop.f32.mrf.mxu3 }
 0x73b   : > { %v2711_v60 = vpop.f32.mrf.mxu2 }
 0x73c   : > { %v2716_v61 = vpack.c.bf16 %v2711_v60, %v2711_v60 }
 0x73e   : > { %3917 = vmatmul.msk.bf16.vlgmr.msra.gmra.mxu1 %vm2490_vm14, %v2716_v61 }
 0x73f   : > { %v2871_v62 = vpop.f32.mrf.mxu3 }
 0x740   : > { %v2876_v63 = vpack.c.bf16 %v2871_v62, %v2871_v62 }
 0x742   : > { %3969 = vmatmul.msk.bf16.vlgmr.msra.gmra.mxu2 %vm2490_vm14, %v2876_v63 }
 0x743   : > { %v2713_v0 = vpop.f32.mrf.mxu2 }
 0x747   : > { %v2873_v1 = vpop.f32.mrf.mxu3 }
 0x74b   : > { %v2858_v2 = vpop.f32.mrf.mxu2 }
 0x74c   : > { %v2875_v3 = vpack.c.bf16 %v2858_v2, %v2858_v2 }
 0x74e   : > { %2985 = vmatmul.bf16.vlgmr.msrb.gmra.mxu1 %v2875_v3 }
 0x753   : > { %v2860_v4 = vpop.f32.mrf.mxu2 }
 0x7bb   : > { %v2839_v7 = vpop.f32.mrf.mxu1 }
 0x7bc   : > { %v2840_v10 = vadd.f32 %v2839_v7, %v2826_v5 }
 0x7be   : > { %v2843_v12 = vadd.f32 %v2840_v10, %v2683_v57 }
 0x7c3   : > { %v2841_v8 = vpop.f32.mrf.mxu1 }
 0x7c5   : > { %v2999_v9 = vpop.f32.mrf.mxu2 }
 0x7cb   : > { %v2986_v11 = vpop.f32.mrf.mxu1 }
 0x7cc   : > { %v3000_v13 = vadd.f32 %v2999_v9, %v2986_v11 }
 0x7cd   : > { %v3001_v14 = vpop.f32.mrf.mxu2 }
 0x7ce   : > { %v3003_v15 = vadd.f32 %v3000_v13, %v2843_v12 }
 0x7d0   : > { %3004 = vst [vmem:[%s690_s15] sm:$0x3] %v3003_v15 }
 0x7d3   : > { %v2988_v16 = vpop.f32.mrf.mxu1 }
 0x7d4 PF: > { %p31_p3 = scmp.ge.s32.totalorder %s4870_s14, 4   ;;  %s5077_s21 = smov %s4648_s22 }
 0x7d5   : > { %s5078_s22 = smov %s4652_s23  ;;  %s5079_s23 = smov %s4881_s5 }
 0x7d6   : > { %s5080_s24 = smov %s4870_s14  ;;  %33 = sbr.rel (!%p31_p3) target bundleno = 18 (0x12), region = 190 }
 0x7db   :  { %3024 = vsyncpa [#allocation3], 1 }
 0x7dc   :  { %3026 = vsyncpa [#allocation3 + $0x1], 1 }
 0x7dd   :  { %3027 = vsyncpa [#allocation5], 1 }
 0x7de   :  { %3028 = vsyncpa [#allocation8], 1 }
 0x7df   :  { %3029 = vsyncpa [#allocation11], 1 }
 0x7e0   :  { %3030 = vsyncpa [#allocation14], 1 }
 0x7e1   :  { %3031 = vsyncpa [#allocation17], 1 }

</bundles_post_ra>
